<compile_context>
chip_gen: v6e
topology: v6e:2x2x1
jax: 0.10.0
libtpu: 0.0.40
codegen_flags: <defaults>
</compile_context>

<pallas_src>
import jax
import jax.numpy as jnp
from jax import lax
from jax.experimental import pallas as pl
from jax.experimental.pallas import tpu as pltpu


# --------------------------------------------------------------------------
# Pallas kernel: one grid step == NB batch elements; the full 5-stage
# SA -> CA -> residual+ReLU loop runs inside the kernel in channel-major
# (C, S) layout, per stream.
# --------------------------------------------------------------------------
def _parallel_ca_kernel(f1_ref, f2_ref, w1_ref, w2_ref, bp1_ref, bp2_ref,
                        out_ref):
    NB, C, S = f1_ref.shape
    CL = bp1_ref.shape[0]                  # channel_low

    # Fused per-stream 1x1 weights: rows [0:CL) = p_f*^T, row CL = c_f*^T.
    w1 = w1_ref[...]                       # (CL+1, C)
    w2 = w2_ref[...]                       # (CL+1, C)

    # ---- hoisted loop invariants (outside element and stage loops) ---------
    bp1_b = jnp.broadcast_to(bp1_ref[...], (CL, S))
    bp2_b = jnp.broadcast_to(bp2_ref[...], (CL, S))

    def softmax_lanes(x):                  # x: (1, S), softmax over spatial
        m = jnp.max(x, axis=1, keepdims=True)
        e = jnp.exp(x - m)
        return e * pl.reciprocal(jnp.sum(e, axis=1, keepdims=True), approx=True)

    def l2norm_rows(h):                    # F.normalize over channels (rows)
        ss = jnp.sum(h * h, axis=0, keepdims=True)
        return h * lax.rsqrt(jnp.maximum(ss, 1e-24))

    def stage(g1, g2):
        """One SA -> CA pass on channel-major (C, S) states g1, g2."""
        # One fused projection matmul per stream (p_f* and c_f* together).
        p1 = jnp.dot(w1, g1, preferred_element_type=jnp.float32)   # (CL+1, S)
        p2 = jnp.dot(w2, g2, preferred_element_type=jnp.float32)
        # SA attention maps.  The c_f* bias is constant along the softmax
        # (spatial) axis, so it cancels exactly -> dropped.
        a1 = softmax_lanes(p1[CL:CL + 1, :])                       # (1, S)
        a2 = softmax_lanes(p2[CL:CL + 1, :])
        s1 = a1 * g1                                               # f1_sa
        s2 = a2 * g2                                               # f2_sa
        # CA low-channel projections reuse the same matmul result:
        #   p_f*(f_sa) = alpha * (p_f* @ f) + b   (alpha is per location).
        ap = a1 * p1[0:CL, :] + bp1_b                              # (CL, S)
        bq = a2 * p2[0:CL, :] + bp2_b                              # (CL, S)
        # A[s, t] = sum_c bq[c, s] * ap[c, t]  (== torch bmm(f2_cl^T, f1_cl))
        A = jnp.tanh(lax.dot_general(bq, ap, (((0,), (0,)), ((), ())),
                                     preferred_element_type=jnp.float32))
        # Big matmuls: bf16 operands, f32 accumulation (MXU-native v6e/v7x).
        Ab = A.astype(jnp.bfloat16)
        # torch: f1_hat = bmm(f1_v, A^T), f2_hat = bmm(f2_v, A) (channel-major)
        h1 = lax.dot_general(s1.astype(jnp.bfloat16), Ab,
                             (((1,), (1,)), ((), ())),
                             preferred_element_type=jnp.float32)   # (C, S)
        h2 = lax.dot_general(s2.astype(jnp.bfloat16), Ab,
                             (((1,), (0,)), ((), ())),
                             preferred_element_type=jnp.float32)   # (C, S)
        return l2norm_rows(h1), l2norm_rows(h2), s1, s2

    def one_element(n, carry):
        g1 = f1_ref[n].astype(jnp.float32)                         # (C, S)
        g2 = f2_ref[n].astype(jnp.float32)
        h1 = h2 = s1 = s2 = None
        for k in range(5):                 # 5 stages, statically unrolled
            h1, h2, s1, s2 = stage(g1, g2)
            if k < 4:                      # residual + ReLU (f32)
                g1 = jnp.maximum(h1 + g1, 0.0)
                g2 = jnp.maximum(h2 + g2, 0.0)
        # Packed channel-dense output slab: [f1_hat; f2_hat; f1_5; f2_5],
        # written with aligned static-slice stores (C is a multiple of 8).
        out_ref[n, 0:C, :] = h1.astype(out_ref.dtype)
        out_ref[n, C:2 * C, :] = h2.astype(out_ref.dtype)
        out_ref[n, 2 * C:3 * C, :] = s1.astype(out_ref.dtype)
        out_ref[n, 3 * C:4 * C, :] = s2.astype(out_ref.dtype)
        return carry

    lax.fori_loop(0, NB, one_element, 0, unroll=True)


# --------------------------------------------------------------------------
# Wrapper: free reshapes + weight packing + pallas_call (no transposes of the
# feature maps anywhere).
# --------------------------------------------------------------------------
@jax.jit
def parallel_ca_pallas(f1_nchw, f2_nchw, params):
    N, C, H, W = f1_nchw.shape
    S = H * W
    CL = params["wp1"].shape[1]

    # NCHW -> (N, C, S) is a free reshape: no transpose / extra HBM round trip.
    f1 = f1_nchw.reshape(N, C, S).astype(jnp.float32)
    f2 = f2_nchw.reshape(N, C, S).astype(jnp.float32)

    # Fused per-stream weights, already oriented for the channel-major matmul:
    # rows [0:CL) = p_f*^T, row CL = c_f*^T.
    w1 = jnp.concatenate([params["wp1"].T, params["wc1"].T], axis=0)  # (CL+1,C)
    w2 = jnp.concatenate([params["wp2"].T, params["wc2"].T], axis=0)
    bp1 = params["bp1"].reshape(CL, 1)
    bp2 = params["bp2"].reshape(CL, 1)

    # Grid: at most 2 "parallel" steps (feeds both v7x TensorCores); each step
    # handles NB batch elements to amortize per-grid-step overhead.
    if N >= 2 and N % 2 == 0:
        G, NB = 2, N // 2
    else:
        G, NB = 1, N

    out = pl.pallas_call(
        _parallel_ca_kernel,
        out_shape=jax.ShapeDtypeStruct((N, 4 * C, S), jnp.float32),
        grid_spec=pltpu.PrefetchScalarGridSpec(
            num_scalar_prefetch=0,
            grid=(G,),
            in_specs=[pl.BlockSpec((NB, C, S), lambda g: (g, 0, 0)),
                      pl.BlockSpec((NB, C, S), lambda g: (g, 0, 0)),
                      pl.BlockSpec((CL + 1, C), lambda g: (0, 0)),
                      pl.BlockSpec((CL + 1, C), lambda g: (0, 0)),
                      pl.BlockSpec((CL, 1), lambda g: (0, 0)),
                      pl.BlockSpec((CL, 1), lambda g: (0, 0))],
            out_specs=pl.BlockSpec((NB, 4 * C, S), lambda g: (g, 0, 0))),
        compiler_params=pltpu.CompilerParams(
            dimension_semantics=("parallel",)),
        # TODO(synk): for production S (>= ~2048) row-block the (S, S) co-attention
        # matrix flash-style and raise vmem_limit_bytes so it fits v7x's 64 MiB VMEM.
    )(f1, f2, w1, w2, bp1, bp2)

    # Unpack the channel-major slab: rows [0:C)=f1_hat, [C:2C)=f2_hat,
    # [2C:3C)=f1_5, [3C:4C)=f2_5.  Only slices + reshapes, no transposes.
    def piece(i):
        return out[:, i * C:(i + 1) * C, :].reshape(N, C, H, W)

    return piece(0), piece(1), piece(2), piece(3)


# --------------------------------------------------------------------------
# Pure-JAX reference (mirrors the PyTorch code in NCHW, high precision).
# --------------------------------------------------------------------------
def parallel_ca_ref(f1, f2, params):
    N, C, H, W = f1.shape
    S = H * W

    def conv1x1(x, w, b):   # x: (N,C,H,W), w: (C,Cout), b: (1,Cout)
        y = jnp.einsum('nchw,co->nohw', x, w, precision='highest')
        return y + b.reshape(-1)[None, :, None, None]

    def forward_sa(a, b):
        c1 = conv1x1(a, params["wc1"], params["bc1"])
        c2 = conv1x1(b, params["wc2"], params["bc2"])
        c1 = jax.nn.softmax(c1.reshape(N, S), axis=1).reshape(N, 1, H, W)
        c2 = jax.nn.softmax(c2.reshape(N, S), axis=1).reshape(N, 1, H, W)
        return c1 * a, c2 * b

    def l2norm(x):
        n = jnp.sqrt(jnp.sum(x * x, axis=1, keepdims=True))
        return x / jnp.maximum(n, 1e-12)

    def forward_ca(a, b):
        a_cl = conv1x1(a, params["wp1"], params["bp1"]).reshape(N, -1, S)
        b_cl = conv1x1(b, params["wp2"], params["bp2"]).reshape(N, -1, S)
        A = jnp.tanh(jnp.einsum('ncs,nct->nst', b_cl, a_cl, precision='highest'))
        a_v = a.reshape(N, C, S)
        b_v = b.reshape(N, C, S)
        a_hat = jnp.einsum('ncs,nts->nct', a_v, A, precision='highest')
        b_hat = jnp.einsum('ncs,nst->nct', b_v, A, precision='highest')
        return (l2norm(a_hat.reshape(N, C, H, W)),
                l2norm(b_hat.reshape(N, C, H, W)))

    for _ in range(4):
        s1, s2 = forward_sa(f1, f2)
        h1, h2 = forward_ca(s1, s2)
        f1 = jax.nn.relu(h1 + f1)
        f2 = jax.nn.relu(h2 + f2)
    s1, s2 = forward_sa(f1, f2)
    h1, h2 = forward_ca(s1, s2)
    return h1, h2, s1, s2


# --------------------------------------------------------------------------
if __name__ == "__main__":
    N, C, H, W = 2, 32, 8, 8            # channel=32 -> channel_low = 2
    CL = C // 16

    key = jax.random.PRNGKey(0)
    k = jax.random.split(key, 10)

    f1 = jax.random.normal(k[0], (N, C, H, W), jnp.float32)
    f2 = jax.random.normal(k[1], (N, C, H, W), jnp.float32)

    # Deterministic synthetic parameters.  Conv2d(C, Cout, 1) weights are
    # stored pre-transposed as (C, Cout); biases as (1, Cout).
    params = {
        "wp1": 0.2 * jax.random.normal(k[2], (C, CL), jnp.float32),
        "bp1": 0.1 * jax.random.normal(k[3], (1, CL), jnp.float32),
        "wp2": 0.2 * jax.random.normal(k[4], (C, CL), jnp.float32),
        "bp2": 0.1 * jax.random.normal(k[5], (1, CL), jnp.float32),
        "wc1": 0.2 * jax.random.normal(k[6], (C, 1), jnp.float32),
        "bc1": 0.1 * jax.random.normal(k[7], (1, 1), jnp.float32),
        "wc2": 0.2 * jax.random.normal(k[8], (C, 1), jnp.float32),
        "bc2": 0.1 * jax.random.normal(k[9], (1, 1), jnp.float32),
    }

    outs = jax.block_until_ready(parallel_ca_pallas(f1, f2, params))
    refs = jax.block_until_ready(parallel_ca_ref(f1, f2, params))

    names = ("f1_hat", "f2_hat", "f1_5", "f2_5")
    for name, o, r in zip(names, outs, refs):
        assert o.shape == (N, C, H, W), (name, o.shape)
        assert bool(jnp.all(jnp.isfinite(o))), name
        err = float(jnp.max(jnp.abs(o - r)))
        # bf16 MXU operands + approx reciprocal add a few-1e-3 drift over the
        # 5 residual stages; the f32 reference path is exact.
        assert err < 2e-2, f"{name} mismatch vs reference: max|diff|={err}"

    print("KERNEL_OK")
</pallas_src>

<mosaic_0001>
module attributes {stable_mosaic.version = 11 : i64} {
  func.func @_parallel_ca_kernel(%arg0: i32, %arg1: memref<1x32x64xf32, #tpu.memory_space<vmem>>, %arg2: memref<1x32x64xf32, #tpu.memory_space<vmem>>, %arg3: memref<3x32xf32, #tpu.memory_space<vmem>>, %arg4: memref<3x32xf32, #tpu.memory_space<vmem>>, %arg5: memref<2x1xf32, #tpu.memory_space<vmem>>, %arg6: memref<2x1xf32, #tpu.memory_space<vmem>>, %arg7: memref<1x128x64xf32, #tpu.memory_space<vmem>>) attributes {dimension_semantics = [#tpu.dimension_semantics<parallel>], iteration_bounds = array<i64: 2>, scalar_prefetch = 0 : i64, scratch_operands = 0 : i64, tpu.core_type = #tpu.core_type<tc>, window_params = [{transform_indices = @transform_0, window_bounds = array<i64: 1, 32, 64>}, {transform_indices = @transform_1, window_bounds = array<i64: 1, 32, 64>}, {pipeline_mode = #tpu.pipeline_mode<synchronous>, transform_indices = @transform_2, window_bounds = array<i64: 3, 32>}, {pipeline_mode = #tpu.pipeline_mode<synchronous>, transform_indices = @transform_3, window_bounds = array<i64: 3, 32>}, {pipeline_mode = #tpu.pipeline_mode<synchronous>, transform_indices = @transform_4, window_bounds = array<i64: 2, 1>}, {pipeline_mode = #tpu.pipeline_mode<synchronous>, transform_indices = @transform_5, window_bounds = array<i64: 2, 1>}, {transform_indices = @transform_6, window_bounds = array<i64: 1, 128, 64>}]} {
    %c0 = arith.constant 0 : index
    %c0_0 = arith.constant 0 : index
    %0 = vector.load %arg3[%c0, %c0_0] : memref<3x32xf32, #tpu.memory_space<vmem>>, vector<3x32xf32>
    %c0_1 = arith.constant 0 : index
    %c0_2 = arith.constant 0 : index
    %1 = vector.load %arg4[%c0_1, %c0_2] : memref<3x32xf32, #tpu.memory_space<vmem>>, vector<3x32xf32>
    %c0_3 = arith.constant 0 : index
    %c0_4 = arith.constant 0 : index
    %2 = vector.load %arg5[%c0_3, %c0_4] : memref<2x1xf32, #tpu.memory_space<vmem>>, vector<2x1xf32>
    %3 = vector.shape_cast %2 : vector<2x1xf32> to vector<2x1xf32>
    %4 = vector.broadcast %3 : vector<2x1xf32> to vector<2x64xf32>
    %c0_5 = arith.constant 0 : index
    %c0_6 = arith.constant 0 : index
    %5 = vector.load %arg6[%c0_5, %c0_6] : memref<2x1xf32, #tpu.memory_space<vmem>>, vector<2x1xf32>
    %6 = vector.shape_cast %5 : vector<2x1xf32> to vector<2x1xf32>
    %7 = vector.broadcast %6 : vector<2x1xf32> to vector<2x64xf32>
    %c0_i32 = arith.constant 0 : i32
    %8 = arith.index_cast %c0_i32 : i32 to index
    %c0_7 = arith.constant 0 : index
    %c0_8 = arith.constant 0 : index
    %9 = vector.load %arg1[%8, %c0_7, %c0_8] : memref<1x32x64xf32, #tpu.memory_space<vmem>>, vector<1x32x64xf32>
    %10 = vector.shape_cast %9 : vector<1x32x64xf32> to vector<32x64xf32>
    %11 = arith.index_cast %c0_i32 : i32 to index
    %c0_9 = arith.constant 0 : index
    %c0_10 = arith.constant 0 : index
    %12 = vector.load %arg2[%11, %c0_9, %c0_10] : memref<1x32x64xf32, #tpu.memory_space<vmem>>, vector<1x32x64xf32>
    %13 = vector.shape_cast %12 : vector<1x32x64xf32> to vector<32x64xf32>
    %cst = arith.constant dense<0.000000e+00> : vector<3x64xf32>
    %14 = tpu.matmul %0, %10, %cst {dimension_numbers = #tpu.dot_dimension_numbers<[1], [0], [0], [1], [0, 0, 1, 1], [], []>} : vector<3x32xf32>, vector<32x64xf32>, vector<3x64xf32> -> vector<3x64xf32>
    %cst_11 = arith.constant dense<0.000000e+00> : vector<3x64xf32>
    %15 = tpu.matmul %1, %13, %cst_11 {dimension_numbers = #tpu.dot_dimension_numbers<[1], [0], [0], [1], [0, 0, 1, 1], [], []>} : vector<3x32xf32>, vector<32x64xf32>, vector<3x64xf32> -> vector<3x64xf32>
    %16 = vector.extract_strided_slice %14 {offsets = [2, 0], sizes = [1, 64], strides = [1, 1]} : vector<3x64xf32> to vector<1x64xf32>
    %cst_12 = arith.constant dense<0xFF800000> : vector<1xf32>
    %17 = vector.multi_reduction <maximumf>, %16, %cst_12 [1] : vector<1x64xf32> to vector<1xf32>
    %18 = vector.shape_cast %17 : vector<1xf32> to vector<1x1xf32>
    %19 = vector.broadcast %18 : vector<1x1xf32> to vector<1x64xf32>
    %20 = arith.subf %16, %19 : vector<1x64xf32>
    %21 = math.exp %20 : vector<1x64xf32>
    %cst_13 = arith.constant dense<0.000000e+00> : vector<1xf32>
    %22 = vector.multi_reduction <add>, %21, %cst_13 [1] : vector<1x64xf32> to vector<1xf32>
    %23 = vector.shape_cast %22 : vector<1xf32> to vector<1x1xf32>
    %24 = tpu.reciprocal %23 {approx = true} : vector<1x1xf32> -> vector<1x1xf32>
    %25 = vector.broadcast %24 : vector<1x1xf32> to vector<1x64xf32>
    %26 = arith.mulf %21, %25 : vector<1x64xf32>
    %27 = vector.extract_strided_slice %15 {offsets = [2, 0], sizes = [1, 64], strides = [1, 1]} : vector<3x64xf32> to vector<1x64xf32>
    %cst_14 = arith.constant dense<0xFF800000> : vector<1xf32>
    %28 = vector.multi_reduction <maximumf>, %27, %cst_14 [1] : vector<1x64xf32> to vector<1xf32>
    %29 = vector.shape_cast %28 : vector<1xf32> to vector<1x1xf32>
    %30 = vector.broadcast %29 : vector<1x1xf32> to vector<1x64xf32>
    %31 = arith.subf %27, %30 : vector<1x64xf32>
    %32 = math.exp %31 : vector<1x64xf32>
    %cst_15 = arith.constant dense<0.000000e+00> : vector<1xf32>
    %33 = vector.multi_reduction <add>, %32, %cst_15 [1] : vector<1x64xf32> to vector<1xf32>
    %34 = vector.shape_cast %33 : vector<1xf32> to vector<1x1xf32>
    %35 = tpu.reciprocal %34 {approx = true} : vector<1x1xf32> -> vector<1x1xf32>
    %36 = vector.broadcast %35 : vector<1x1xf32> to vector<1x64xf32>
    %37 = arith.mulf %32, %36 : vector<1x64xf32>
    %38 = vector.broadcast %26 : vector<1x64xf32> to vector<32x64xf32>
    %39 = arith.mulf %38, %10 : vector<32x64xf32>
    %40 = vector.broadcast %37 : vector<1x64xf32> to vector<32x64xf32>
    %41 = arith.mulf %40, %13 : vector<32x64xf32>
    %42 = vector.extract_strided_slice %14 {offsets = [0, 0], sizes = [2, 64], strides = [1, 1]} : vector<3x64xf32> to vector<2x64xf32>
    %43 = vector.broadcast %26 : vector<1x64xf32> to vector<2x64xf32>
    %44 = arith.mulf %43, %42 : vector<2x64xf32>
    %45 = arith.addf %44, %4 : vector<2x64xf32>
    %46 = vector.extract_strided_slice %15 {offsets = [0, 0], sizes = [2, 64], strides = [1, 1]} : vector<3x64xf32> to vector<2x64xf32>
    %47 = vector.broadcast %37 : vector<1x64xf32> to vector<2x64xf32>
    %48 = arith.mulf %47, %46 : vector<2x64xf32>
    %49 = arith.addf %48, %7 : vector<2x64xf32>
    %cst_16 = arith.constant dense<0.000000e+00> : vector<64x64xf32>
    %50 = tpu.matmul %49, %45, %cst_16 {dimension_numbers = #tpu.dot_dimension_numbers<[0], [0], [1], [1], [0, 1, 1, 1], [], []>} : vector<2x64xf32>, vector<2x64xf32>, vector<64x64xf32> -> vector<64x64xf32>
    %51 = math.tanh %50 : vector<64x64xf32>
    %52 = arith.truncf %51 : vector<64x64xf32> to vector<64x64xbf16>
    %53 = arith.truncf %39 : vector<32x64xf32> to vector<32x64xbf16>
    %cst_17 = arith.constant dense<0.000000e+00> : vector<32x64xf32>
    %54 = tpu.matmul %53, %52, %cst_17 {dimension_numbers = #tpu.dot_dimension_numbers<[1], [1], [0], [0], [0, 0, 1, 0], [], []>} : vector<32x64xbf16>, vector<64x64xbf16>, vector<32x64xf32> -> vector<32x64xf32>
    %55 = arith.truncf %41 : vector<32x64xf32> to vector<32x64xbf16>
    %cst_18 = arith.constant dense<0.000000e+00> : vector<32x64xf32>
    %56 = tpu.matmul %55, %52, %cst_18 {dimension_numbers = #tpu.dot_dimension_numbers<[1], [0], [0], [1], [0, 0, 1, 1], [], []>} : vector<32x64xbf16>, vector<64x64xbf16>, vector<32x64xf32> -> vector<32x64xf32>
    %57 = arith.mulf %54, %54 : vector<32x64xf32>
    %cst_19 = arith.constant dense<0.000000e+00> : vector<64xf32>
    %58 = vector.multi_reduction <add>, %57, %cst_19 [0] : vector<32x64xf32> to vector<64xf32>
    %59 = vector.shape_cast %58 : vector<64xf32> to vector<1x64xf32>
    %cst_20 = arith.constant 1.000000e-24 : f32
    %60 = vector.broadcast %cst_20 : f32 to vector<1x64xf32>
    %61 = arith.maximumf %59, %60 : vector<1x64xf32>
    %62 = math.rsqrt %61 : vector<1x64xf32>
    %63 = vector.broadcast %62 : vector<1x64xf32> to vector<32x64xf32>
    %64 = arith.mulf %54, %63 : vector<32x64xf32>
    %65 = arith.mulf %56, %56 : vector<32x64xf32>
    %cst_21 = arith.constant dense<0.000000e+00> : vector<64xf32>
    %66 = vector.multi_reduction <add>, %65, %cst_21 [0] : vector<32x64xf32> to vector<64xf32>
    %67 = vector.shape_cast %66 : vector<64xf32> to vector<1x64xf32>
    %cst_22 = arith.constant 1.000000e-24 : f32
    %68 = vector.broadcast %cst_22 : f32 to vector<1x64xf32>
    %69 = arith.maximumf %67, %68 : vector<1x64xf32>
    %70 = math.rsqrt %69 : vector<1x64xf32>
    %71 = vector.broadcast %70 : vector<1x64xf32> to vector<32x64xf32>
    %72 = arith.mulf %56, %71 : vector<32x64xf32>
    %73 = arith.addf %64, %10 : vector<32x64xf32>
    %cst_23 = arith.constant 0.000000e+00 : f32
    %74 = vector.broadcast %cst_23 : f32 to vector<32x64xf32>
    %75 = arith.maximumf %73, %74 : vector<32x64xf32>
    %76 = arith.addf %72, %13 : vector<32x64xf32>
    %cst_24 = arith.constant 0.000000e+00 : f32
    %77 = vector.broadcast %cst_24 : f32 to vector<32x64xf32>
    %78 = arith.maximumf %76, %77 : vector<32x64xf32>
    %cst_25 = arith.constant dense<0.000000e+00> : vector<3x64xf32>
    %79 = tpu.matmul %0, %75, %cst_25 {dimension_numbers = #tpu.dot_dimension_numbers<[1], [0], [0], [1], [0, 0, 1, 1], [], []>} : vector<3x32xf32>, vector<32x64xf32>, vector<3x64xf32> -> vector<3x64xf32>
    %cst_26 = arith.constant dense<0.000000e+00> : vector<3x64xf32>
    %80 = tpu.matmul %1, %78, %cst_26 {dimension_numbers = #tpu.dot_dimension_numbers<[1], [0], [0], [1], [0, 0, 1, 1], [], []>} : vector<3x32xf32>, vector<32x64xf32>, vector<3x64xf32> -> vector<3x64xf32>
    %81 = vector.extract_strided_slice %79 {offsets = [2, 0], sizes = [1, 64], strides = [1, 1]} : vector<3x64xf32> to vector<1x64xf32>
    %cst_27 = arith.constant dense<0xFF800000> : vector<1xf32>
    %82 = vector.multi_reduction <maximumf>, %81, %cst_27 [1] : vector<1x64xf32> to vector<1xf32>
    %83 = vector.shape_cast %82 : vector<1xf32> to vector<1x1xf32>
    %84 = vector.broadcast %83 : vector<1x1xf32> to vector<1x64xf32>
    %85 = arith.subf %81, %84 : vector<1x64xf32>
    %86 = math.exp %85 : vector<1x64xf32>
    %cst_28 = arith.constant dense<0.000000e+00> : vector<1xf32>
    %87 = vector.multi_reduction <add>, %86, %cst_28 [1] : vector<1x64xf32> to vector<1xf32>
    %88 = vector.shape_cast %87 : vector<1xf32> to vector<1x1xf32>
    %89 = tpu.reciprocal %88 {approx = true} : vector<1x1xf32> -> vector<1x1xf32>
    %90 = vector.broadcast %89 : vector<1x1xf32> to vector<1x64xf32>
    %91 = arith.mulf %86, %90 : vector<1x64xf32>
    %92 = vector.extract_strided_slice %80 {offsets = [2, 0], sizes = [1, 64], strides = [1, 1]} : vector<3x64xf32> to vector<1x64xf32>
    %cst_29 = arith.constant dense<0xFF800000> : vector<1xf32>
    %93 = vector.multi_reduction <maximumf>, %92, %cst_29 [1] : vector<1x64xf32> to vector<1xf32>
    %94 = vector.shape_cast %93 : vector<1xf32> to vector<1x1xf32>
    %95 = vector.broadcast %94 : vector<1x1xf32> to vector<1x64xf32>
    %96 = arith.subf %92, %95 : vector<1x64xf32>
    %97 = math.exp %96 : vector<1x64xf32>
    %cst_30 = arith.constant dense<0.000000e+00> : vector<1xf32>
    %98 = vector.multi_reduction <add>, %97, %cst_30 [1] : vector<1x64xf32> to vector<1xf32>
    %99 = vector.shape_cast %98 : vector<1xf32> to vector<1x1xf32>
    %100 = tpu.reciprocal %99 {approx = true} : vector<1x1xf32> -> vector<1x1xf32>
    %101 = vector.broadcast %100 : vector<1x1xf32> to vector<1x64xf32>
    %102 = arith.mulf %97, %101 : vector<1x64xf32>
    %103 = vector.broadcast %91 : vector<1x64xf32> to vector<32x64xf32>
    %104 = arith.mulf %103, %75 : vector<32x64xf32>
    %105 = vector.broadcast %102 : vector<1x64xf32> to vector<32x64xf32>
    %106 = arith.mulf %105, %78 : vector<32x64xf32>
    %107 = vector.extract_strided_slice %79 {offsets = [0, 0], sizes = [2, 64], strides = [1, 1]} : vector<3x64xf32> to vector<2x64xf32>
    %108 = vector.broadcast %91 : vector<1x64xf32> to vector<2x64xf32>
    %109 = arith.mulf %108, %107 : vector<2x64xf32>
    %110 = arith.addf %109, %4 : vector<2x64xf32>
    %111 = vector.extract_strided_slice %80 {offsets = [0, 0], sizes = [2, 64], strides = [1, 1]} : vector<3x64xf32> to vector<2x64xf32>
    %112 = vector.broadcast %102 : vector<1x64xf32> to vector<2x64xf32>
    %113 = arith.mulf %112, %111 : vector<2x64xf32>
    %114 = arith.addf %113, %7 : vector<2x64xf32>
    %cst_31 = arith.constant dense<0.000000e+00> : vector<64x64xf32>
    %115 = tpu.matmul %114, %110, %cst_31 {dimension_numbers = #tpu.dot_dimension_numbers<[0], [0], [1], [1], [0, 1, 1, 1], [], []>} : vector<2x64xf32>, vector<2x64xf32>, vector<64x64xf32> -> vector<64x64xf32>
    %116 = math.tanh %115 : vector<64x64xf32>
    %117 = arith.truncf %116 : vector<64x64xf32> to vector<64x64xbf16>
    %118 = arith.truncf %104 : vector<32x64xf32> to vector<32x64xbf16>
    %cst_32 = arith.constant dense<0.000000e+00> : vector<32x64xf32>
    %119 = tpu.matmul %118, %117, %cst_32 {dimension_numbers = #tpu.dot_dimension_numbers<[1], [1], [0], [0], [0, 0, 1, 0], [], []>} : vector<32x64xbf16>, vector<64x64xbf16>, vector<32x64xf32> -> vector<32x64xf32>
    %120 = arith.truncf %106 : vector<32x64xf32> to vector<32x64xbf16>
    %cst_33 = arith.constant dense<0.000000e+00> : vector<32x64xf32>
    %121 = tpu.matmul %120, %117, %cst_33 {dimension_numbers = #tpu.dot_dimension_numbers<[1], [0], [0], [1], [0, 0, 1, 1], [], []>} : vector<32x64xbf16>, vector<64x64xbf16>, vector<32x64xf32> -> vector<32x64xf32>
    %122 = arith.mulf %119, %119 : vector<32x64xf32>
    %cst_34 = arith.constant dense<0.000000e+00> : vector<64xf32>
    %123 = vector.multi_reduction <add>, %122, %cst_34 [0] : vector<32x64xf32> to vector<64xf32>
    %124 = vector.shape_cast %123 : vector<64xf32> to vector<1x64xf32>
    %cst_35 = arith.constant 1.000000e-24 : f32
    %125 = vector.broadcast %cst_35 : f32 to vector<1x64xf32>
    %126 = arith.maximumf %124, %125 : vector<1x64xf32>
    %127 = math.rsqrt %126 : vector<1x64xf32>
    %128 = vector.broadcast %127 : vector<1x64xf32> to vector<32x64xf32>
    %129 = arith.mulf %119, %128 : vector<32x64xf32>
    %130 = arith.mulf %121, %121 : vector<32x64xf32>
    %cst_36 = arith.constant dense<0.000000e+00> : vector<64xf32>
    %131 = vector.multi_reduction <add>, %130, %cst_36 [0] : vector<32x64xf32> to vector<64xf32>
    %132 = vector.shape_cast %131 : vector<64xf32> to vector<1x64xf32>
    %cst_37 = arith.constant 1.000000e-24 : f32
    %133 = vector.broadcast %cst_37 : f32 to vector<1x64xf32>
    %134 = arith.maximumf %132, %133 : vector<1x64xf32>
    %135 = math.rsqrt %134 : vector<1x64xf32>
    %136 = vector.broadcast %135 : vector<1x64xf32> to vector<32x64xf32>
    %137 = arith.mulf %121, %136 : vector<32x64xf32>
    %138 = arith.addf %129, %75 : vector<32x64xf32>
    %cst_38 = arith.constant 0.000000e+00 : f32
    %139 = vector.broadcast %cst_38 : f32 to vector<32x64xf32>
    %140 = arith.maximumf %138, %139 : vector<32x64xf32>
    %141 = arith.addf %137, %78 : vector<32x64xf32>
    %cst_39 = arith.constant 0.000000e+00 : f32
    %142 = vector.broadcast %cst_39 : f32 to vector<32x64xf32>
    %143 = arith.maximumf %141, %142 : vector<32x64xf32>
    %cst_40 = arith.constant dense<0.000000e+00> : vector<3x64xf32>
    %144 = tpu.matmul %0, %140, %cst_40 {dimension_numbers = #tpu.dot_dimension_numbers<[1], [0], [0], [1], [0, 0, 1, 1], [], []>} : vector<3x32xf32>, vector<32x64xf32>, vector<3x64xf32> -> vector<3x64xf32>
    %cst_41 = arith.constant dense<0.000000e+00> : vector<3x64xf32>
    %145 = tpu.matmul %1, %143, %cst_41 {dimension_numbers = #tpu.dot_dimension_numbers<[1], [0], [0], [1], [0, 0, 1, 1], [], []>} : vector<3x32xf32>, vector<32x64xf32>, vector<3x64xf32> -> vector<3x64xf32>
    %146 = vector.extract_strided_slice %144 {offsets = [2, 0], sizes = [1, 64], strides = [1, 1]} : vector<3x64xf32> to vector<1x64xf32>
    %cst_42 = arith.constant dense<0xFF800000> : vector<1xf32>
    %147 = vector.multi_reduction <maximumf>, %146, %cst_42 [1] : vector<1x64xf32> to vector<1xf32>
    %148 = vector.shape_cast %147 : vector<1xf32> to vector<1x1xf32>
    %149 = vector.broadcast %148 : vector<1x1xf32> to vector<1x64xf32>
    %150 = arith.subf %146, %149 : vector<1x64xf32>
    %151 = math.exp %150 : vector<1x64xf32>
    %cst_43 = arith.constant dense<0.000000e+00> : vector<1xf32>
    %152 = vector.multi_reduction <add>, %151, %cst_43 [1] : vector<1x64xf32> to vector<1xf32>
    %153 = vector.shape_cast %152 : vector<1xf32> to vector<1x1xf32>
    %154 = tpu.reciprocal %153 {approx = true} : vector<1x1xf32> -> vector<1x1xf32>
    %155 = vector.broadcast %154 : vector<1x1xf32> to vector<1x64xf32>
    %156 = arith.mulf %151, %155 : vector<1x64xf32>
    %157 = vector.extract_strided_slice %145 {offsets = [2, 0], sizes = [1, 64], strides = [1, 1]} : vector<3x64xf32> to vector<1x64xf32>
    %cst_44 = arith.constant dense<0xFF800000> : vector<1xf32>
    %158 = vector.multi_reduction <maximumf>, %157, %cst_44 [1] : vector<1x64xf32> to vector<1xf32>
    %159 = vector.shape_cast %158 : vector<1xf32> to vector<1x1xf32>
    %160 = vector.broadcast %159 : vector<1x1xf32> to vector<1x64xf32>
    %161 = arith.subf %157, %160 : vector<1x64xf32>
    %162 = math.exp %161 : vector<1x64xf32>
    %cst_45 = arith.constant dense<0.000000e+00> : vector<1xf32>
    %163 = vector.multi_reduction <add>, %162, %cst_45 [1] : vector<1x64xf32> to vector<1xf32>
    %164 = vector.shape_cast %163 : vector<1xf32> to vector<1x1xf32>
    %165 = tpu.reciprocal %164 {approx = true} : vector<1x1xf32> -> vector<1x1xf32>
    %166 = vector.broadcast %165 : vector<1x1xf32> to vector<1x64xf32>
    %167 = arith.mulf %162, %166 : vector<1x64xf32>
    %168 = vector.broadcast %156 : vector<1x64xf32> to vector<32x64xf32>
    %169 = arith.mulf %168, %140 : vector<32x64xf32>
    %170 = vector.broadcast %167 : vector<1x64xf32> to vector<32x64xf32>
    %171 = arith.mulf %170, %143 : vector<32x64xf32>
    %172 = vector.extract_strided_slice %144 {offsets = [0, 0], sizes = [2, 64], strides = [1, 1]} : vector<3x64xf32> to vector<2x64xf32>
    %173 = vector.broadcast %156 : vector<1x64xf32> to vector<2x64xf32>
    %174 = arith.mulf %173, %172 : vector<2x64xf32>
    %175 = arith.addf %174, %4 : vector<2x64xf32>
    %176 = vector.extract_strided_slice %145 {offsets = [0, 0], sizes = [2, 64], strides = [1, 1]} : vector<3x64xf32> to vector<2x64xf32>
    %177 = vector.broadcast %167 : vector<1x64xf32> to vector<2x64xf32>
    %178 = arith.mulf %177, %176 : vector<2x64xf32>
    %179 = arith.addf %178, %7 : vector<2x64xf32>
    %cst_46 = arith.constant dense<0.000000e+00> : vector<64x64xf32>
    %180 = tpu.matmul %179, %175, %cst_46 {dimension_numbers = #tpu.dot_dimension_numbers<[0], [0], [1], [1], [0, 1, 1, 1], [], []>} : vector<2x64xf32>, vector<2x64xf32>, vector<64x64xf32> -> vector<64x64xf32>
    %181 = math.tanh %180 : vector<64x64xf32>
    %182 = arith.truncf %181 : vector<64x64xf32> to vector<64x64xbf16>
    %183 = arith.truncf %169 : vector<32x64xf32> to vector<32x64xbf16>
    %cst_47 = arith.constant dense<0.000000e+00> : vector<32x64xf32>
    %184 = tpu.matmul %183, %182, %cst_47 {dimension_numbers = #tpu.dot_dimension_numbers<[1], [1], [0], [0], [0, 0, 1, 0], [], []>} : vector<32x64xbf16>, vector<64x64xbf16>, vector<32x64xf32> -> vector<32x64xf32>
    %185 = arith.truncf %171 : vector<32x64xf32> to vector<32x64xbf16>
    %cst_48 = arith.constant dense<0.000000e+00> : vector<32x64xf32>
    %186 = tpu.matmul %185, %182, %cst_48 {dimension_numbers = #tpu.dot_dimension_numbers<[1], [0], [0], [1], [0, 0, 1, 1], [], []>} : vector<32x64xbf16>, vector<64x64xbf16>, vector<32x64xf32> -> vector<32x64xf32>
    %187 = arith.mulf %184, %184 : vector<32x64xf32>
    %cst_49 = arith.constant dense<0.000000e+00> : vector<64xf32>
    %188 = vector.multi_reduction <add>, %187, %cst_49 [0] : vector<32x64xf32> to vector<64xf32>
    %189 = vector.shape_cast %188 : vector<64xf32> to vector<1x64xf32>
    %cst_50 = arith.constant 1.000000e-24 : f32
    %190 = vector.broadcast %cst_50 : f32 to vector<1x64xf32>
    %191 = arith.maximumf %189, %190 : vector<1x64xf32>
    %192 = math.rsqrt %191 : vector<1x64xf32>
    %193 = vector.broadcast %192 : vector<1x64xf32> to vector<32x64xf32>
    %194 = arith.mulf %184, %193 : vector<32x64xf32>
    %195 = arith.mulf %186, %186 : vector<32x64xf32>
    %cst_51 = arith.constant dense<0.000000e+00> : vector<64xf32>
    %196 = vector.multi_reduction <add>, %195, %cst_51 [0] : vector<32x64xf32> to vector<64xf32>
    %197 = vector.shape_cast %196 : vector<64xf32> to vector<1x64xf32>
    %cst_52 = arith.constant 1.000000e-24 : f32
    %198 = vector.broadcast %cst_52 : f32 to vector<1x64xf32>
    %199 = arith.maximumf %197, %198 : vector<1x64xf32>
    %200 = math.rsqrt %199 : vector<1x64xf32>
    %201 = vector.broadcast %200 : vector<1x64xf32> to vector<32x64xf32>
    %202 = arith.mulf %186, %201 : vector<32x64xf32>
    %203 = arith.addf %194, %140 : vector<32x64xf32>
    %cst_53 = arith.constant 0.000000e+00 : f32
    %204 = vector.broadcast %cst_53 : f32 to vector<32x64xf32>
    %205 = arith.maximumf %203, %204 : vector<32x64xf32>
    %206 = arith.addf %202, %143 : vector<32x64xf32>
    %cst_54 = arith.constant 0.000000e+00 : f32
    %207 = vector.broadcast %cst_54 : f32 to vector<32x64xf32>
    %208 = arith.maximumf %206, %207 : vector<32x64xf32>
    %cst_55 = arith.constant dense<0.000000e+00> : vector<3x64xf32>
    %209 = tpu.matmul %0, %205, %cst_55 {dimension_numbers = #tpu.dot_dimension_numbers<[1], [0], [0], [1], [0, 0, 1, 1], [], []>} : vector<3x32xf32>, vector<32x64xf32>, vector<3x64xf32> -> vector<3x64xf32>
    %cst_56 = arith.constant dense<0.000000e+00> : vector<3x64xf32>
    %210 = tpu.matmul %1, %208, %cst_56 {dimension_numbers = #tpu.dot_dimension_numbers<[1], [0], [0], [1], [0, 0, 1, 1], [], []>} : vector<3x32xf32>, vector<32x64xf32>, vector<3x64xf32> -> vector<3x64xf32>
    %211 = vector.extract_strided_slice %209 {offsets = [2, 0], sizes = [1, 64], strides = [1, 1]} : vector<3x64xf32> to vector<1x64xf32>
    %cst_57 = arith.constant dense<0xFF800000> : vector<1xf32>
    %212 = vector.multi_reduction <maximumf>, %211, %cst_57 [1] : vector<1x64xf32> to vector<1xf32>
    %213 = vector.shape_cast %212 : vector<1xf32> to vector<1x1xf32>
    %214 = vector.broadcast %213 : vector<1x1xf32> to vector<1x64xf32>
    %215 = arith.subf %211, %214 : vector<1x64xf32>
    %216 = math.exp %215 : vector<1x64xf32>
    %cst_58 = arith.constant dense<0.000000e+00> : vector<1xf32>
    %217 = vector.multi_reduction <add>, %216, %cst_58 [1] : vector<1x64xf32> to vector<1xf32>
    %218 = vector.shape_cast %217 : vector<1xf32> to vector<1x1xf32>
    %219 = tpu.reciprocal %218 {approx = true} : vector<1x1xf32> -> vector<1x1xf32>
    %220 = vector.broadcast %219 : vector<1x1xf32> to vector<1x64xf32>
    %221 = arith.mulf %216, %220 : vector<1x64xf32>
    %222 = vector.extract_strided_slice %210 {offsets = [2, 0], sizes = [1, 64], strides = [1, 1]} : vector<3x64xf32> to vector<1x64xf32>
    %cst_59 = arith.constant dense<0xFF800000> : vector<1xf32>
    %223 = vector.multi_reduction <maximumf>, %222, %cst_59 [1] : vector<1x64xf32> to vector<1xf32>
    %224 = vector.shape_cast %223 : vector<1xf32> to vector<1x1xf32>
    %225 = vector.broadcast %224 : vector<1x1xf32> to vector<1x64xf32>
    %226 = arith.subf %222, %225 : vector<1x64xf32>
    %227 = math.exp %226 : vector<1x64xf32>
    %cst_60 = arith.constant dense<0.000000e+00> : vector<1xf32>
    %228 = vector.multi_reduction <add>, %227, %cst_60 [1] : vector<1x64xf32> to vector<1xf32>
    %229 = vector.shape_cast %228 : vector<1xf32> to vector<1x1xf32>
    %230 = tpu.reciprocal %229 {approx = true} : vector<1x1xf32> -> vector<1x1xf32>
    %231 = vector.broadcast %230 : vector<1x1xf32> to vector<1x64xf32>
    %232 = arith.mulf %227, %231 : vector<1x64xf32>
    %233 = vector.broadcast %221 : vector<1x64xf32> to vector<32x64xf32>
    %234 = arith.mulf %233, %205 : vector<32x64xf32>
    %235 = vector.broadcast %232 : vector<1x64xf32> to vector<32x64xf32>
    %236 = arith.mulf %235, %208 : vector<32x64xf32>
    %237 = vector.extract_strided_slice %209 {offsets = [0, 0], sizes = [2, 64], strides = [1, 1]} : vector<3x64xf32> to vector<2x64xf32>
    %238 = vector.broadcast %221 : vector<1x64xf32> to vector<2x64xf32>
    %239 = arith.mulf %238, %237 : vector<2x64xf32>
    %240 = arith.addf %239, %4 : vector<2x64xf32>
    %241 = vector.extract_strided_slice %210 {offsets = [0, 0], sizes = [2, 64], strides = [1, 1]} : vector<3x64xf32> to vector<2x64xf32>
    %242 = vector.broadcast %232 : vector<1x64xf32> to vector<2x64xf32>
    %243 = arith.mulf %242, %241 : vector<2x64xf32>
    %244 = arith.addf %243, %7 : vector<2x64xf32>
    %cst_61 = arith.constant dense<0.000000e+00> : vector<64x64xf32>
    %245 = tpu.matmul %244, %240, %cst_61 {dimension_numbers = #tpu.dot_dimension_numbers<[0], [0], [1], [1], [0, 1, 1, 1], [], []>} : vector<2x64xf32>, vector<2x64xf32>, vector<64x64xf32> -> vector<64x64xf32>
    %246 = math.tanh %245 : vector<64x64xf32>
    %247 = arith.truncf %246 : vector<64x64xf32> to vector<64x64xbf16>
    %248 = arith.truncf %234 : vector<32x64xf32> to vector<32x64xbf16>
    %cst_62 = arith.constant dense<0.000000e+00> : vector<32x64xf32>
    %249 = tpu.matmul %248, %247, %cst_62 {dimension_numbers = #tpu.dot_dimension_numbers<[1], [1], [0], [0], [0, 0, 1, 0], [], []>} : vector<32x64xbf16>, vector<64x64xbf16>, vector<32x64xf32> -> vector<32x64xf32>
    %250 = arith.truncf %236 : vector<32x64xf32> to vector<32x64xbf16>
    %cst_63 = arith.constant dense<0.000000e+00> : vector<32x64xf32>
    %251 = tpu.matmul %250, %247, %cst_63 {dimension_numbers = #tpu.dot_dimension_numbers<[1], [0], [0], [1], [0, 0, 1, 1], [], []>} : vector<32x64xbf16>, vector<64x64xbf16>, vector<32x64xf32> -> vector<32x64xf32>
    %252 = arith.mulf %249, %249 : vector<32x64xf32>
    %cst_64 = arith.constant dense<0.000000e+00> : vector<64xf32>
    %253 = vector.multi_reduction <add>, %252, %cst_64 [0] : vector<32x64xf32> to vector<64xf32>
    %254 = vector.shape_cast %253 : vector<64xf32> to vector<1x64xf32>
    %cst_65 = arith.constant 1.000000e-24 : f32
    %255 = vector.broadcast %cst_65 : f32 to vector<1x64xf32>
    %256 = arith.maximumf %254, %255 : vector<1x64xf32>
    %257 = math.rsqrt %256 : vector<1x64xf32>
    %258 = vector.broadcast %257 : vector<1x64xf32> to vector<32x64xf32>
    %259 = arith.mulf %249, %258 : vector<32x64xf32>
    %260 = arith.mulf %251, %251 : vector<32x64xf32>
    %cst_66 = arith.constant dense<0.000000e+00> : vector<64xf32>
    %261 = vector.multi_reduction <add>, %260, %cst_66 [0] : vector<32x64xf32> to vector<64xf32>
    %262 = vector.shape_cast %261 : vector<64xf32> to vector<1x64xf32>
    %cst_67 = arith.constant 1.000000e-24 : f32
    %263 = vector.broadcast %cst_67 : f32 to vector<1x64xf32>
    %264 = arith.maximumf %262, %263 : vector<1x64xf32>
    %265 = math.rsqrt %264 : vector<1x64xf32>
    %266 = vector.broadcast %265 : vector<1x64xf32> to vector<32x64xf32>
    %267 = arith.mulf %251, %266 : vector<32x64xf32>
    %268 = arith.addf %259, %205 : vector<32x64xf32>
    %cst_68 = arith.constant 0.000000e+00 : f32
    %269 = vector.broadcast %cst_68 : f32 to vector<32x64xf32>
    %270 = arith.maximumf %268, %269 : vector<32x64xf32>
    %271 = arith.addf %267, %208 : vector<32x64xf32>
    %cst_69 = arith.constant 0.000000e+00 : f32
    %272 = vector.broadcast %cst_69 : f32 to vector<32x64xf32>
    %273 = arith.maximumf %271, %272 : vector<32x64xf32>
    %cst_70 = arith.constant dense<0.000000e+00> : vector<3x64xf32>
    %274 = tpu.matmul %0, %270, %cst_70 {dimension_numbers = #tpu.dot_dimension_numbers<[1], [0], [0], [1], [0, 0, 1, 1], [], []>} : vector<3x32xf32>, vector<32x64xf32>, vector<3x64xf32> -> vector<3x64xf32>
    %cst_71 = arith.constant dense<0.000000e+00> : vector<3x64xf32>
    %275 = tpu.matmul %1, %273, %cst_71 {dimension_numbers = #tpu.dot_dimension_numbers<[1], [0], [0], [1], [0, 0, 1, 1], [], []>} : vector<3x32xf32>, vector<32x64xf32>, vector<3x64xf32> -> vector<3x64xf32>
    %276 = vector.extract_strided_slice %274 {offsets = [2, 0], sizes = [1, 64], strides = [1, 1]} : vector<3x64xf32> to vector<1x64xf32>
    %cst_72 = arith.constant dense<0xFF800000> : vector<1xf32>
    %277 = vector.multi_reduction <maximumf>, %276, %cst_72 [1] : vector<1x64xf32> to vector<1xf32>
    %278 = vector.shape_cast %277 : vector<1xf32> to vector<1x1xf32>
    %279 = vector.broadcast %278 : vector<1x1xf32> to vector<1x64xf32>
    %280 = arith.subf %276, %279 : vector<1x64xf32>
    %281 = math.exp %280 : vector<1x64xf32>
    %cst_73 = arith.constant dense<0.000000e+00> : vector<1xf32>
    %282 = vector.multi_reduction <add>, %281, %cst_73 [1] : vector<1x64xf32> to vector<1xf32>
    %283 = vector.shape_cast %282 : vector<1xf32> to vector<1x1xf32>
    %284 = tpu.reciprocal %283 {approx = true} : vector<1x1xf32> -> vector<1x1xf32>
    %285 = vector.broadcast %284 : vector<1x1xf32> to vector<1x64xf32>
    %286 = arith.mulf %281, %285 : vector<1x64xf32>
    %287 = vector.extract_strided_slice %275 {offsets = [2, 0], sizes = [1, 64], strides = [1, 1]} : vector<3x64xf32> to vector<1x64xf32>
    %cst_74 = arith.constant dense<0xFF800000> : vector<1xf32>
    %288 = vector.multi_reduction <maximumf>, %287, %cst_74 [1] : vector<1x64xf32> to vector<1xf32>
    %289 = vector.shape_cast %288 : vector<1xf32> to vector<1x1xf32>
    %290 = vector.broadcast %289 : vector<1x1xf32> to vector<1x64xf32>
    %291 = arith.subf %287, %290 : vector<1x64xf32>
    %292 = math.exp %291 : vector<1x64xf32>
    %cst_75 = arith.constant dense<0.000000e+00> : vector<1xf32>
    %293 = vector.multi_reduction <add>, %292, %cst_75 [1] : vector<1x64xf32> to vector<1xf32>
    %294 = vector.shape_cast %293 : vector<1xf32> to vector<1x1xf32>
    %295 = tpu.reciprocal %294 {approx = true} : vector<1x1xf32> -> vector<1x1xf32>
    %296 = vector.broadcast %295 : vector<1x1xf32> to vector<1x64xf32>
    %297 = arith.mulf %292, %296 : vector<1x64xf32>
    %298 = vector.broadcast %286 : vector<1x64xf32> to vector<32x64xf32>
    %299 = arith.mulf %298, %270 : vector<32x64xf32>
    %300 = vector.broadcast %297 : vector<1x64xf32> to vector<32x64xf32>
    %301 = arith.mulf %300, %273 : vector<32x64xf32>
    %302 = vector.extract_strided_slice %274 {offsets = [0, 0], sizes = [2, 64], strides = [1, 1]} : vector<3x64xf32> to vector<2x64xf32>
    %303 = vector.broadcast %286 : vector<1x64xf32> to vector<2x64xf32>
    %304 = arith.mulf %303, %302 : vector<2x64xf32>
    %305 = arith.addf %304, %4 : vector<2x64xf32>
    %306 = vector.extract_strided_slice %275 {offsets = [0, 0], sizes = [2, 64], strides = [1, 1]} : vector<3x64xf32> to vector<2x64xf32>
    %307 = vector.broadcast %297 : vector<1x64xf32> to vector<2x64xf32>
    %308 = arith.mulf %307, %306 : vector<2x64xf32>
    %309 = arith.addf %308, %7 : vector<2x64xf32>
    %cst_76 = arith.constant dense<0.000000e+00> : vector<64x64xf32>
    %310 = tpu.matmul %309, %305, %cst_76 {dimension_numbers = #tpu.dot_dimension_numbers<[0], [0], [1], [1], [0, 1, 1, 1], [], []>} : vector<2x64xf32>, vector<2x64xf32>, vector<64x64xf32> -> vector<64x64xf32>
    %311 = math.tanh %310 : vector<64x64xf32>
    %312 = arith.truncf %311 : vector<64x64xf32> to vector<64x64xbf16>
    %313 = arith.truncf %299 : vector<32x64xf32> to vector<32x64xbf16>
    %cst_77 = arith.constant dense<0.000000e+00> : vector<32x64xf32>
    %314 = tpu.matmul %313, %312, %cst_77 {dimension_numbers = #tpu.dot_dimension_numbers<[1], [1], [0], [0], [0, 0, 1, 0], [], []>} : vector<32x64xbf16>, vector<64x64xbf16>, vector<32x64xf32> -> vector<32x64xf32>
    %315 = arith.truncf %301 : vector<32x64xf32> to vector<32x64xbf16>
    %cst_78 = arith.constant dense<0.000000e+00> : vector<32x64xf32>
    %316 = tpu.matmul %315, %312, %cst_78 {dimension_numbers = #tpu.dot_dimension_numbers<[1], [0], [0], [1], [0, 0, 1, 1], [], []>} : vector<32x64xbf16>, vector<64x64xbf16>, vector<32x64xf32> -> vector<32x64xf32>
    %317 = arith.mulf %314, %314 : vector<32x64xf32>
    %cst_79 = arith.constant dense<0.000000e+00> : vector<64xf32>
    %318 = vector.multi_reduction <add>, %317, %cst_79 [0] : vector<32x64xf32> to vector<64xf32>
    %319 = vector.shape_cast %318 : vector<64xf32> to vector<1x64xf32>
    %cst_80 = arith.constant 1.000000e-24 : f32
    %320 = vector.broadcast %cst_80 : f32 to vector<1x64xf32>
    %321 = arith.maximumf %319, %320 : vector<1x64xf32>
    %322 = math.rsqrt %321 : vector<1x64xf32>
    %323 = vector.broadcast %322 : vector<1x64xf32> to vector<32x64xf32>
    %324 = arith.mulf %314, %323 : vector<32x64xf32>
    %325 = arith.mulf %316, %316 : vector<32x64xf32>
    %cst_81 = arith.constant dense<0.000000e+00> : vector<64xf32>
    %326 = vector.multi_reduction <add>, %325, %cst_81 [0] : vector<32x64xf32> to vector<64xf32>
    %327 = vector.shape_cast %326 : vector<64xf32> to vector<1x64xf32>
    %cst_82 = arith.constant 1.000000e-24 : f32
    %328 = vector.broadcast %cst_82 : f32 to vector<1x64xf32>
    %329 = arith.maximumf %327, %328 : vector<1x64xf32>
    %330 = math.rsqrt %329 : vector<1x64xf32>
    %331 = vector.broadcast %330 : vector<1x64xf32> to vector<32x64xf32>
    %332 = arith.mulf %316, %331 : vector<32x64xf32>
    %333 = arith.index_cast %c0_i32 : i32 to index
    %c0_83 = arith.constant 0 : index
    %c0_84 = arith.constant 0 : index
    %334 = vector.load %arg7[%333, %c0_83, %c0_84] : memref<1x128x64xf32, #tpu.memory_space<vmem>>, vector<1x32x64xf32>
    %335 = vector.shape_cast %334 : vector<1x32x64xf32> to vector<32x64xf32>
    %336 = vector.shape_cast %324 : vector<32x64xf32> to vector<1x32x64xf32>
    tpu.vector_store %arg7[%333, %c0_83, %c0_84], %336 {strides = array<i32>} : memref<1x128x64xf32, #tpu.memory_space<vmem>>, vector<1x32x64xf32>,
    %337 = arith.index_cast %c0_i32 : i32 to index
    %c32 = arith.constant 32 : index
    %c0_85 = arith.constant 0 : index
    %338 = vector.load %arg7[%337, %c32, %c0_85] : memref<1x128x64xf32, #tpu.memory_space<vmem>>, vector<1x32x64xf32>
    %339 = vector.shape_cast %338 : vector<1x32x64xf32> to vector<32x64xf32>
    %340 = vector.shape_cast %332 : vector<32x64xf32> to vector<1x32x64xf32>
    tpu.vector_store %arg7[%337, %c32, %c0_85], %340 {strides = array<i32>} : memref<1x128x64xf32, #tpu.memory_space<vmem>>, vector<1x32x64xf32>,
    %341 = arith.index_cast %c0_i32 : i32 to index
    %c64 = arith.constant 64 : index
    %c0_86 = arith.constant 0 : index
    %342 = vector.load %arg7[%341, %c64, %c0_86] : memref<1x128x64xf32, #tpu.memory_space<vmem>>, vector<1x32x64xf32>
    %343 = vector.shape_cast %342 : vector<1x32x64xf32> to vector<32x64xf32>
    %344 = vector.shape_cast %299 : vector<32x64xf32> to vector<1x32x64xf32>
    tpu.vector_store %arg7[%341, %c64, %c0_86], %344 {strides = array<i32>} : memref<1x128x64xf32, #tpu.memory_space<vmem>>, vector<1x32x64xf32>,
    %345 = arith.index_cast %c0_i32 : i32 to index
    %c96 = arith.constant 96 : index
    %c0_87 = arith.constant 0 : index
    %346 = vector.load %arg7[%345, %c96, %c0_87] : memref<1x128x64xf32, #tpu.memory_space<vmem>>, vector<1x32x64xf32>
    %347 = vector.shape_cast %346 : vector<1x32x64xf32> to vector<32x64xf32>
    %348 = vector.shape_cast %301 : vector<32x64xf32> to vector<1x32x64xf32>
    tpu.vector_store %arg7[%345, %c96, %c0_87], %348 {strides = array<i32>} : memref<1x128x64xf32, #tpu.memory_space<vmem>>, vector<1x32x64xf32>,
    %c1_i32 = arith.constant 1 : i32
    return
  }
  func.func @transform_0(%arg0: i32) -> (i32, i32, i32) {
    %c0_i32 = arith.constant 0 : i32
    %c0_i32_0 = arith.constant 0 : i32
    %c0_i32_1 = arith.constant 0 : i32
    return %arg0, %c0_i32, %c0_i32_0 : i32, i32, i32
  }
  func.func @transform_1(%arg0: i32) -> (i32, i32, i32) {
    %c0_i32 = arith.constant 0 : i32
    %c0_i32_0 = arith.constant 0 : i32
    %c0_i32_1 = arith.constant 0 : i32
    return %arg0, %c0_i32, %c0_i32_0 : i32, i32, i32
  }
  func.func @transform_2(%arg0: i32) -> (i32, i32) {
    %c0_i32 = arith.constant 0 : i32
    %c0_i32_0 = arith.constant 0 : i32
    %c0_i32_1 = arith.constant 0 : i32
    return %c0_i32, %c0_i32_0 : i32, i32
  }
  func.func @transform_3(%arg0: i32) -> (i32, i32) {
    %c0_i32 = arith.constant 0 : i32
    %c0_i32_0 = arith.constant 0 : i32
    %c0_i32_1 = arith.constant 0 : i32
    return %c0_i32, %c0_i32_0 : i32, i32
  }
  func.func @transform_4(%arg0: i32) -> (i32, i32) {
    %c0_i32 = arith.constant 0 : i32
    %c0_i32_0 = arith.constant 0 : i32
    %c0_i32_1 = arith.constant 0 : i32
    return %c0_i32, %c0_i32_0 : i32, i32
  }
  func.func @transform_5(%arg0: i32) -> (i32, i32) {
    %c0_i32 = arith.constant 0 : i32
    %c0_i32_0 = arith.constant 0 : i32
    %c0_i32_1 = arith.constant 0 : i32
    return %c0_i32, %c0_i32_0 : i32, i32
  }
  func.func @transform_6(%arg0: i32) -> (i32, i32, i32) {
    %c0_i32 = arith.constant 0 : i32
    %c0_i32_0 = arith.constant 0 : i32
    %c0_i32_1 = arith.constant 0 : i32
    return %arg0, %c0_i32, %c0_i32_0 : i32, i32, i32
  }
}

</mosaic_0001>

<bundles_post_ra>
// kernel: parallel_ca_pallas.1
= control target key start
LH: loop header
LB: loop body
LE: loop exit
PB: predicated region body
PF: predicated region fallthrough
CT: control target
= control target key end

     0   :  { %s3870_s21 = smov 0   ;;  %s4519_s0 = inlined_call_operand.vmem [shape: f32[2,32,64], index: 0, kind: input, shape index: {}]   ;;  %s4520_s1 = inlined_call_operand.vmem [shape: f32[2,32,64], index: 1, kind: input, shape index: {}]   ;;  %s4521_s2 = inlined_call_operand.vmem [shape: f32[3,32], index: 2, kind: input, shape index: {}]   ;;  %s4522_s3 = inlined_call_operand.vmem [shape: f32[3,32], index: 3, kind: input, shape index: {}]   ;;  %s4523_s4 = inlined_call_operand.vmem [shape: f32[2,1], index: 4, kind: input, shape index: {}]   ;;  %s4524_s5 = inlined_call_operand.vmem [shape: f32[2,1], index: 5, kind: input, shape index: {}]   ;;  %s4525_s6 = inlined_call_operand.vmem [shape: f32[2,128,64], index: 6, kind: output, shape index: {}]  }
   0x1 LB: > { %s3103_s22 = sadd.s32 4294967295, %s3830_s21   ;;  %p3107_p0 = scmp.ge.s32.totalorder %s3830_s21, 1  ;;  %s3830_s21 = sphi %s3870_s21, %s16_s21  }
   0x2   : > { %p222_p1 = scmp.lt.s32.totalorder %s3830_s21, 3 }
   0x4   : > { %p223_p2 = pnand %p3107_p0, %p222_p1 }
   0x5   : > { %p257_p3 = scmp.lt.s32.totalorder (!%p223_p2), %s3103_s22, 1 }
   0x6   : > { %226 = sbr.rel (%p223_p2) target bundleno = 5826 (0x16c2), region = 44 }
   0xb   : > { %v3832_v0 = vmov 0.0   ;;  %s4527_s22 = smov (!%p257_p3, %s3103_s22), 1  ;;  %vm3833_vm0 = vmmov 0   ;;  %v3919_v8 = vld [vmem:[%s4522_s3] sm:$0x7]  ;;  %vm295_vm1 = vcmask 261120   ;;  %v465_v32 = vlaneseq }
   0xc   : > { %3360 = vmatprep.subr.mxu1 %v3832_v0  ;;  %3349 = vmatprep.subr.mxu0 %v3832_v0  ;;  %s3191_s23 = sshll.u32 %s4527_s22, 5  ;;  %v3928_v10 = vld [vmem:[%s4521_s2] sm:$0x7]  ;;  %vm442_vm2 = vcmask 518146   ;;  %v3834_v17 = vmov 0   ;;  %vm542_vm3 = vcmask 1041408  }
   0xd   : > { %3368 = vmatprep.mubr.msk.f32.mxu1 %vm3833_vm0, %v3832_v0  ;;  %3357 = vmatprep.mubr.msk.f32.mxu0 %vm3833_vm0, %v3832_v0  ;;  %s266_s26 = scalar_lea.vmem %s4520_s1, %s3191_s23  ;;  %s261_s29 = scalar_lea.vmem %s4519_s0, %s3191_s23  ;;  %v281_v28 = vld [vmem:[%s4524_s5] sm:$0x3]  ;;  %v466_v33 = vshrl.u32 %v465_v32, 7  ;;  %vm665_vm4 = vcmask 523264   ;;  %vm517_vm5 = vcmask 15360  }
   0xe   : > { %v3890_v1 = vld [vmem:[%s266_s26 + $0x18] sm:$0xff]  ;;  %v3892_v2 = vld [vmem:[%s266_s26 + $0x10] sm:$0xff]  ;;  %v3904_v5 = vld [vmem:[%s266_s26 + $0x8] sm:$0xff]  ;;  %3680 = vset.pattern.permute.xlu1 %v3834_v17  ;;  %3681 = vset.pattern.permute.xlu0 %v3834_v17  ;;  %s3193_s18 = sshll.u32 %s4527_s22, 7 }
   0xf   : > { %3361 = vmatpush3.msra.mxu1 %v3890_v1  ;;  %v3898_v3 = vld [vmem:[%s261_s29 + $0x18] sm:$0xff]  ;;  %v3900_v4 = vld [vmem:[%s261_s29 + $0x10] sm:$0xff]  ;;  %v3908_v6 = vld [vmem:[%s261_s29 + $0x8] sm:$0xff]  ;;  %v3947_v34 = vsub.s32 2, %v466_v33  ;;  %s4419_s23 = scalar_lea.vmem %s4525_s6, %s3193_s18 }
  0x10   : > { %3362 = vmatprep.subr.mxu1 %v3832_v0  ;;  %3350 = vmatpush3.msra.mxu0 %v3898_v3  ;;  %v3912_v7 = vld [vmem:[%s266_s26] sm:$0xff] }
  0x11   : > { %3363 = vmatpush3.msra.mxu1 %v3892_v2  ;;  %3351 = vmatprep.subr.mxu0 %v3832_v0  ;;  %v3921_v9 = vld [vmem:[%s261_s29] sm:$0xff] }
  0x12   : > { %3364 = vmatprep.subr.mxu1 %v3832_v0  ;;  %3352 = vmatpush3.msra.mxu0 %v3900_v4  ;;  %v275_v29 = vld [vmem:[%s4523_s4] sm:$0x3] }
  0x13   : > { %3365 = vmatpush3.msra.mxu1 %v3904_v5  ;;  %3353 = vmatprep.subr.mxu0 %v3832_v0 }
  0x14   : > { %3366 = vmatprep.subr.mxu1 %v3832_v0  ;;  %3354 = vmatpush3.msra.mxu0 %v3908_v6 }
  0x15   : > { %3367 = vmatpush3.msra.mxu1 %v3912_v7  ;;  %3355 = vmatprep.subr.mxu0 %v3832_v0 }
  0x16   : > { %3369 = vmatmul.mubr.msk.f32.vlgmr.msra.gmra.mxu1 %vm295_vm1, %v3919_v8  ;;  %3356 = vmatpush3.msra.mxu0 %v3921_v9 }
  0x17   : > { %3358 = vmatmul.mubr.msk.f32.vlgmr.msra.gmra.mxu0 %vm295_vm1, %v3928_v10 }
  0xd6   : > { %v438_v11 = vpop.f32.mrf.mxu1 }
  0xd7   : > { %v454_v12 = vsel %vm442_vm2, %v438_v11, -inf  ;;  %v365_v13 = vpop.f32.mrf.mxu0 }
  0xd8   : > { %455 = vmax.xlane.f32.xlu0 %v454_v12  ;;  %v3370_v14 = vpop.f32.mrf.mxu1  ;;  %v443_v15 = vsel %vm442_vm2, %v365_v13, -inf }
  0xd9   : > { %v3359_v16 = vpop.f32.mrf.mxu0 }
  0xdc   : > { %444 = vmax.xlane.f32.xlu0 %v443_v15 }
 0x161   : > { %v456_v18 = vpop.xlane.xlu0 %455 }
 0x162   : > { %v457_v19 = vsub.f32 %v438_v11, %v456_v18 }
 0x164   : > { %v458_v20 = vmul.f32 1.442695, %v457_v19 }
 0x165   : > { %v445_v21 = vpop.xlane.xlu0 %444 }
 0x166   : > { %3682 = vpow2.f32 %v458_v20  ;;  %v446_v22 = vsub.f32 %v365_v13, %v445_v21 }
 0x168   : > { %v447_v23 = vmul.f32 1.442695, %v446_v22 }
 0x16a   : > { %3684 = vpow2.f32 %v447_v23 }
 0x173   : > { %v3683_v24 = vpop.eup %3682 }
 0x174   : > { %v460_v25 = vsel %vm442_vm2, %v3683_v24, 0.0 }
 0x175   : > { %461 = vadd.xlane.f32.xlu1 %v460_v25 }
 0x177   : > { %v3685_v26 = vpop.eup %3684 }
 0x178   : > { %v449_v27 = vsel %vm442_vm2, %v3685_v26, 0.0 }
 0x179   : > { %450 = vadd.xlane.f32.xlu0 %v449_v27 }
 0x186   : > { %284 = vperm.xlu1 %3680, %v281_v28  }
 0x18f   : > { %278 = vperm.xlu0 %3681, %v275_v29  }
 0x1fe   : > { %v462_v30 = vpop.xlane.xlu1 %461 }
 0x1ff   : > { %3686 = vrcp.f32 %v462_v30 }
 0x202   : > { %v451_v31 = vpop.xlane.xlu0 %450  ;;  %v3952_v39 = vpop.permute.xlu1 %284 }
 0x203   : > { %3688 = vrcp.f32 %v451_v31 }
 0x20a   : > { %v3959_v44 = vpop.permute.xlu0 %278 }
 0x20c   : > { %v3687_v35 = vpop.eup %3686 }
 0x20d   : > { %v464_v36 = vmul.f32 %v3687_v35, %v3683_v24 }
 0x20f   : > { %v3950_v37 = vrot.slane %v464_v36, %v3947_v34 }
 0x210   : > { %v3689_v38 = vpop.eup %3688 }
 0x211   : > { %v453_v40 = vmul.f32 %v3689_v38, %v3685_v26  ;;  %v483_v41 = vmul.f32 %v3950_v37, %v438_v11  ;;  %v477_v57 = vmul.f32 %v3950_v37, %v3912_v7  ;;  %v478_v58 = vmul.f32 %v3950_v37, %v3904_v5 }
 0x212   : > { %v479_v30 = vmul.f32 %v3950_v37, %v3892_v2  ;;  %v480_v31 = vmul.f32 %v3950_v37, %v3890_v1 }
 0x213   : > { %v3956_v42 = vrot.slane %v453_v40, %v3947_v34  ;;  %v484_v43 = vadd.f32 %v483_v41, %v3952_v39  ;;  %v733_v60 = vpack.c.bf16 %v478_v58, %v477_v57 }
 0x214   : > { %v734_v32 = vpack.c.bf16 %v480_v31, %v479_v30 }
 0x215   : > { %485 = vxpose.xlu1.b32.start.end [1/1] (short) (narrow) %v484_v43, 64  ;;  %v481_v45 = vmul.f32 %v3956_v42, %v365_v13  ;;  %v469_v46 = vmul.f32 %v3956_v42, %v3921_v9  ;;  %v470_v47 = vmul.f32 %v3956_v42, %v3908_v6  ;;  %v471_v36 = vmul.f32 %v3956_v42, %v3900_v4 }
 0x216   : > { %v472_v37 = vmul.f32 %v3956_v42, %v3898_v3 }
 0x217   : > { %v482_v48 = vadd.f32 %v481_v45, %v3959_v44  ;;  %v663_v49 = vpack.c.bf16 %v470_v47, %v469_v46 }
 0x218   : > { %v664_v38 = vpack.c.bf16 %v472_v37, %v471_v36 }
 0x219   : > { %3371 = vmatprep.subr.msk.mxu0 %vm542_vm3, %v482_v48  ;;  %3393 = vmatprep.mubr.msk.bf16.mxu1 %vm665_vm4, %v663_v49 }
 0x21a   : > { %3372 = vmatpush3.msk.msra.mxu0 %vm542_vm3, %v482_v48 }
 0x291   : > { %v501_v50 = vpop.trf.xlu1 }
 0x292   : > { %3373 = vmatprep.mubr.msk.f32.mxu0 %vm517_vm5, %v501_v50 }
 0x295   : > { %v502_v51 = vpop.trf.xlu1 }
 0x296   : > { %3374 = vmatmul.mubr.msk.f32.vlgmr.msra.gmra.mxu0 %vm517_vm5, %v502_v51 }
 0x299   : > { %v503_v52 = vpop.trf.xlu1 }
 0x29a   : > { %3376 = vmatprep.mubr.msk.f32.mxu0 %vm517_vm5, %v503_v52 }
 0x29d   : > { %v504_v53 = vpop.trf.xlu1 }
 0x29e   : > { %3377 = vmatmul.mubr.msk.f32.gmra.mxu0 %vm517_vm5, %v504_v53 }
 0x2a1   : > { %v505_v54 = vpop.trf.xlu1 }
 0x2a2   : > { %3379 = vmatprep.mubr.msk.f32.mxu0 %vm517_vm5, %v505_v54 }
 0x2a5   : > { %v506_v55 = vpop.trf.xlu1 }
 0x2a6   : > { %3380 = vmatmul.mubr.msk.f32.gmra.mxu0 %vm517_vm5, %v506_v55 }
 0x2a9   : > { %v507_v56 = vpop.trf.xlu1 }
 0x2aa   : > { %3382 = vmatprep.mubr.msk.f32.mxu0 %vm517_vm5, %v507_v56 }
 0x2ad   : > { %v508_v59 = vpop.trf.xlu1 }
 0x2ae   : > { %3383 = vmatmul.mubr.msk.f32.gmra.mxu0 %vm517_vm5, %v508_v59 }
 0x2af   : > { %3405 = vmatprep.mubr.msk.bf16.mxu0 %vm665_vm4, %v733_v60 }
 0x356   : > { %v3375_v61 = vpop.f32.mrf.mxu0 }
 0x358   : > { %v612_v62 = vpop.f32.mrf.mxu0 }
 0x35e   : > { %v3378_v63 = vpop.f32.mrf.mxu0 }
 0x360   : > { %v622_v11 = vpop.f32.mrf.mxu0 }
 0x366   : > { %v3381_v12 = vpop.f32.mrf.mxu0 }
 0x368   : > { %v632_v13 = vpop.f32.mrf.mxu0 }
 0x369   : > { %3690 = vtanh.f32 %v632_v13 }
 0x36e   : > { %v3384_v14 = vpop.f32.mrf.mxu0 }
 0x36f   : > { %3692 = vtanh.f32 %v3384_v14 }
 0x370   : > { %v642_v15 = vpop.f32.mrf.mxu0 }
 0x371   : > { %3694 = vtanh.f32 %v642_v15 }
 0x372   : > { %3696 = vtanh.f32 %v3381_v12 }
 0x373   : > { %3698 = vtanh.f32 %v622_v11 }
 0x374   : > { %3700 = vtanh.f32 %v3378_v63 }
 0x375   : > { %3702 = vtanh.f32 %v612_v62 }
 0x376   : > { %3704 = vtanh.f32 %v3375_v61  ;;  %v3691_v16 = vpop.eup %3690 }
 0x37c   : > { %v3693_v17 = vpop.eup %3692 }
 0x37e   : > { %v3695_v18 = vpop.eup %3694 }
 0x37f   : > { %v662_v19 = vpack.c.bf16 %v3693_v17, %v3695_v18  ;;  %v3697_v20 = vpop.eup %3696 }
 0x380   : > { %v661_v22 = vpack.c.bf16 %v3697_v20, %v3691_v16  ;;  %v3699_v23 = vpop.eup %3698 }
 0x381   : > { %3649 = vmatprep.subr.msk.bf16.mxu1 %vm665_vm4, %v662_v19  ;;  %3397 = vmatprep.subr.bf16.mxu0 %v662_v19  ;;  %v682_v21 = vsel %vm665_vm4, %v662_v19, 0  ;;  %v3701_v24 = vpop.eup %3700 }
 0x382   : > { %3386 = vmatpush3.bf16.xpose.msra.mxu1 %v682_v21  ;;  %3398 = vmatpush3.bf16.msra.mxu0 %v662_v19  ;;  %v660_v25 = vpack.c.bf16 %v3701_v24, %v3699_v23  ;;  %v3703_v26 = vpop.eup %3702  ;;  %v679_v28 = vsel %vm665_vm4, %v661_v22, 0 }
 0x383   : > { %3650 = vmatprep.subr.msk.bf16.mxu1 %vm665_vm4, %v661_v22  ;;  %3399 = vmatprep.subr.bf16.mxu0 %v661_v22  ;;  %v3705_v27 = vpop.eup %3704 }
 0x384   : > { %v659_v29 = vpack.c.bf16 %v3705_v27, %v3703_v26  ;;  %v676_v33 = vsel %vm665_vm4, %v660_v25, 0 }
 0x386   : > { %3400 = vmatpush3.bf16.msra.mxu0 %v661_v22  ;;  %v673_v35 = vsel %vm665_vm4, %v659_v29, 0 }
 0x387   : > { %3401 = vmatprep.subr.bf16.mxu0 %v660_v25 }
 0x38a   : > { %3388 = vmatpush3.bf16.xpose.msra.mxu1 %v679_v28  ;;  %3402 = vmatpush3.bf16.msra.mxu0 %v660_v25 }
 0x38b   : > { %3651 = vmatprep.subr.msk.bf16.mxu1 %vm665_vm4, %v660_v25  ;;  %3403 = vmatprep.subr.bf16.mxu0 %v659_v29 }
 0x38e   : > { %3404 = vmatpush3.bf16.msra.mxu0 %v659_v29 }
 0x38f   : > { %3409 = vmatprep.subr.mxu0 %v3832_v0 }
 0x391   : > { %3406 = vmatmul.mubr.msk.bf16.vlgmr.msra.gmra.mxu0 %vm665_vm4, %v734_v32 }
 0x392   : > { %3390 = vmatpush3.bf16.xpose.msra.mxu1 %v676_v33  ;;  %3417 = vmatprep.mubr.msk.f32.mxu0 %vm3833_vm0, %v3832_v0 }
 0x393   : > { %3652 = vmatprep.subr.msk.bf16.mxu1 %vm665_vm4, %v659_v29 }
 0x39a   : > { %3392 = vmatpush3.bf16.xpose.msra.mxu1 %v673_v35 }
 0x3a1   : > { %3394 = vmatmul.mubr.msk.bf16.vlgmr.msra.gmra.mxu1 %vm665_vm4, %v664_v38 }
 0x451   : > { %v3407_v40 = vpop.f32.mrf.mxu0 }
 0x452   : > { %v815_v47 = vmul.f32 %v3407_v40, %v3407_v40 }
 0x453   : > { %v4004_v41 = vpop.f32.mrf.mxu0 }
 0x454   : > { %v813_v45 = vmul.f32 %v4004_v41, %v4004_v41  ;;  %v820_v42 = vsel %vm665_vm4, %v815_v47, 0.0 }
 0x455   : > { %v3408_v43 = vpop.f32.mrf.mxu0 }
 0x456   : > { %v817_v49 = vsel %vm665_vm4, %v813_v45, 0.0  ;;  %v816_v52 = vmul.f32 %v3408_v43, %v3408_v43 }
 0x457   : > { %v778_v46 = vpop.f32.mrf.mxu0 }
 0x458   : > { %v814_v48 = vmul.f32 %v778_v46, %v778_v46  ;;  %v822_v54 = vsel %vm665_vm4, %v816_v52, 0.0 }
 0x45a   : > { %v818_v50 = vsel %vm665_vm4, %v814_v48, 0.0 }
 0x45b   : > { %v819_v51 = vadd.f32 %v818_v50, %v817_v49 }
 0x45d   : > { %v821_v53 = vadd.f32 %v820_v42, %v819_v51 }
 0x45f   : > { %v823_v55 = vadd.f32 %v822_v54, %v821_v53 }
 0x461   : > { %v3395_v56 = vpop.f32.mrf.mxu1  ;;  %v824_v58 = vrot.slane %v823_v55, 4 }
 0x462   : > { %v792_v62 = vmul.f32 %v3395_v56, %v3395_v56 }
 0x463   : > { %v718_v57 = vpop.f32.mrf.mxu1  ;;  %v825_v11 = vadd.f32 %v824_v58, %v823_v55 }
 0x464   : > { %v790_v60 = vmul.f32 %v718_v57, %v718_v57  ;;  %v797_v16 = vsel %vm665_vm4, %v792_v62, 0.0 }
 0x465   : > { %v3396_v59 = vpop.f32.mrf.mxu1  ;;  %v826_v17 = vrot.slane %v825_v11, 2 }
 0x466   : > { %v794_v12 = vsel %vm665_vm4, %v790_v60, 0.0  ;;  %v793_v13 = vmul.f32 %v3396_v59, %v3396_v59 }
 0x467   : > { %v721_v61 = vpop.f32.mrf.mxu1  ;;  %v827_v21 = vadd.f32 %v826_v17, %v825_v11 }
 0x468   : > { %v791_v63 = vmul.f32 %v721_v61, %v721_v61  ;;  %v799_v19 = vsel %vm665_vm4, %v793_v13, 0.0 }
 0x469   : > { %v828_v24 = vrot.slane %v827_v21, 1 }
 0x46a   : > { %v795_v14 = vsel %vm665_vm4, %v791_v63, 0.0 }
 0x46b   : > { %v796_v15 = vadd.f32 %v795_v14, %v794_v12  ;;  %v829_v27 = vadd.f32 %v828_v24, %v827_v21 }
 0x46d   : > { %v798_v18 = vadd.f32 %v797_v16, %v796_v15  ;;  %v830_v30 = vmax.f32 %v829_v27, 1e-24 }
 0x46f   : > { %v800_v20 = vadd.f32 %v799_v19, %v798_v18 }
 0x471   : > { %v801_v22 = vrot.slane %v800_v20, 4 }
 0x473   : > { %v802_v23 = vadd.f32 %v801_v22, %v800_v20 }
 0x475   : > { %v803_v25 = vrot.slane %v802_v23, 2 }
 0x477   : > { %v804_v26 = vadd.f32 %v803_v25, %v802_v23 }
 0x479   : > { %v805_v28 = vrot.slane %v804_v26, 1 }
 0x47b   : > { %v806_v29 = vadd.f32 %v805_v28, %v804_v26 }
 0x47d   : > { %v807_v31 = vmax.f32 %v806_v29, 1e-24 }
 0x47f   : > { %3706 = vrsqrt.f32 %v807_v31 }
 0x480   : > { %3708 = vrsqrt.f32 %v830_v30 }
 0x48c   : > { %v3707_v32 = vpop.eup %3706 }
 0x48d   : > { %v810_v33 = vmul.f32 %v3707_v32, %v721_v61  ;;  %v812_v35 = vmul.f32 %v3707_v32, %v3396_v59  ;;  %v811_v36 = vmul.f32 %v3707_v32, %v3395_v56  ;;  %v3709_v37 = vpop.eup %3708  ;;  %v809_v47 = vmul.f32 %v3707_v32, %v718_v57 }
 0x48e   : > { %v835_v50 = vmul.f32 %v3709_v37, %v3408_v43  ;;  %v834_v52 = vmul.f32 %v3709_v37, %v3407_v40  ;;  %v833_v53 = vmul.f32 %v3709_v37, %v778_v46 }
 0x48f   : > { %v839_v38 = vadd.f32 %v812_v35, %v3898_v3  ;;  %v838_v45 = vadd.f32 %v811_v36, %v3900_v4  ;;  %v837_v48 = vadd.f32 %v810_v33, %v3908_v6  ;;  %v836_v42 = vadd.f32 %v809_v47, %v3921_v9 }
 0x490   : > { %v847_v3 = vadd.f32 %v835_v50, %v3890_v1  ;;  %v846_v6 = vadd.f32 %v834_v52, %v3892_v2  ;;  %v832_v9 = vmul.f32 %v3709_v37, %v4004_v41  ;;  %v845_v40 = vadd.f32 %v833_v53, %v3904_v5 }
 0x491   : > { %v4019_v49 = vmax.f32 %v839_v38, 0.0  ;;  %v4022_v51 = vmax.f32 %v838_v45, 0.0  ;;  %v4026_v54 = vmax.f32 %v837_v48, 0.0  ;;  %v4032_v4 = vmax.f32 %v836_v42, 0.0 }
 0x492   : > { %v4039_v43 = vmax.f32 %v847_v3, 0.0  ;;  %v4045_v1 = vmax.f32 %v846_v6, 0.0  ;;  %v844_v2 = vadd.f32 %v832_v9, %v3912_v7  ;;  %v4051_v5 = vmax.f32 %v845_v40, 0.0 }
 0x493   : > { %3410 = vmatpush3.msra.mxu0 %v4019_v49 }
 0x494   : > { %3411 = vmatprep.subr.mxu0 %v3832_v0  ;;  %v4056_v41 = vmax.f32 %v844_v2, 0.0 }
 0x495   : > { %3412 = vmatpush3.msra.mxu0 %v4022_v51 }
 0x496   : > { %3413 = vmatprep.subr.mxu0 %v3832_v0 }
 0x497   : > { %3414 = vmatpush3.msra.mxu0 %v4026_v54 }
 0x498   : > { %3415 = vmatprep.subr.mxu0 %v3832_v0 }
 0x499   : > { %3416 = vmatpush3.msra.mxu0 %v4032_v4 }
 0x49a   : > { %3418 = vmatmul.mubr.msk.f32.vlgmr.msra.gmra.mxu0 %vm295_vm1, %v3928_v10  ;;  %3420 = vmatprep.subr.mxu0 %v3832_v0 }
 0x49b   : > { %3421 = vmatpush3.msra.mxu0 %v4039_v43  ;;  %3428 = vmatprep.mubr.msk.f32.mxu0 %vm3833_vm0, %v3832_v0 }
 0x49c   : > { %3422 = vmatprep.subr.mxu0 %v3832_v0 }
 0x49d   : > { %3423 = vmatpush3.msra.mxu0 %v4045_v1 }
 0x49e   : > { %3424 = vmatprep.subr.mxu0 %v3832_v0 }
 0x49f   : > { %3425 = vmatpush3.msra.mxu0 %v4051_v5 }
 0x4a0   : > { %3426 = vmatprep.subr.mxu0 %v3832_v0 }
 0x4a1   : > { %3427 = vmatpush3.msra.mxu0 %v4056_v41 }
 0x4a2   : > { %3429 = vmatmul.mubr.msk.f32.vlgmr.msra.gmra.mxu0 %vm295_vm1, %v3919_v8 }
 0x55a   : > { %v918_v7 = vpop.f32.mrf.mxu0 }
 0x55b   : > { %v992_v46 = vsel %vm442_vm2, %v918_v7, -inf }
 0x55c   : > { %993 = vmax.xlane.f32.xlu1 %v992_v46  ;;  %v3419_v55 = vpop.f32.mrf.mxu0 }
 0x562   : > { %v988_v56 = vpop.f32.mrf.mxu0 }
 0x563   : > { %v1003_v57 = vsel %vm442_vm2, %v988_v56, -inf }
 0x564   : > { %1004 = vmax.xlane.f32.xlu0 %v1003_v57  ;;  %v3430_v58 = vpop.f32.mrf.mxu0 }
 0x5e5   : > { %v994_v59 = vpop.xlane.xlu1 %993 }
 0x5e6   : > { %v995_v60 = vsub.f32 %v918_v7, %v994_v59 }
 0x5e8   : > { %v996_v63 = vmul.f32 1.442695, %v995_v60 }
 0x5ed   : > { %v1005_v61 = vpop.xlane.xlu0 %1004 }
 0x5ee   : > { %v1006_v62 = vsub.f32 %v988_v56, %v1005_v61 }
 0x5f0   : > { %v1007_v11 = vmul.f32 1.442695, %v1006_v62 }
 0x5f2   : > { %3710 = vpow2.f32 %v1007_v11 }
 0x5f3   : > { %3712 = vpow2.f32 %v996_v63 }
 0x5ff   : > { %v3711_v12 = vpop.eup %3710 }
 0x600   : > { %v1009_v13 = vsel %vm442_vm2, %v3711_v12, 0.0  ;;  %v3713_v14 = vpop.eup %3712 }
 0x601   : > { %1010 = vadd.xlane.f32.xlu0 %v1009_v13  ;;  %v998_v15 = vsel %vm442_vm2, %v3713_v14, 0.0 }
 0x605   : > { %999 = vadd.xlane.f32.xlu0 %v998_v15 }
 0x68a   : > { %v1011_v16 = vpop.xlane.xlu0 %1010 }
 0x68b   : > { %3714 = vrcp.f32 %v1011_v16 }
 0x68e   : > { %v1000_v17 = vpop.xlane.xlu0 %999 }
 0x68f   : > { %3716 = vrcp.f32 %v1000_v17 }
 0x698   : > { %v3715_v18 = vpop.eup %3714 }
 0x699   : > { %v1013_v19 = vmul.f32 %v3715_v18, %v3711_v12 }
 0x69b   : > { %v4067_v20 = vrot.slane %v1013_v19, %v3947_v34 }
 0x69c   : > { %v3717_v21 = vpop.eup %3716 }
 0x69d   : > { %v1002_v22 = vmul.f32 %v3717_v21, %v3713_v14  ;;  %v1032_v23 = vmul.f32 %v4067_v20, %v988_v56  ;;  %v1026_v45 = vmul.f32 %v4067_v20, %v4056_v41  ;;  %v1027_v47 = vmul.f32 %v4067_v20, %v4051_v5 }
 0x69e   : > { %v1028_v14 = vmul.f32 %v4067_v20, %v4045_v1  ;;  %v1029_v15 = vmul.f32 %v4067_v20, %v4039_v43 }
 0x69f   : > { %v4071_v24 = vrot.slane %v1002_v22, %v3947_v34  ;;  %v1033_v25 = vadd.f32 %v1032_v23, %v3952_v39  ;;  %v1279_v50 = vpack.c.bf16 %v1027_v47, %v1026_v45 }
 0x6a0   : > { %v1280_v16 = vpack.c.bf16 %v1029_v15, %v1028_v14 }
 0x6a1   : > { %1034 = vxpose.xlu0.b32.start.end [1/1] (short) (narrow) %v1033_v25, 64  ;;  %v1030_v26 = vmul.f32 %v4071_v24, %v918_v7  ;;  %v1018_v27 = vmul.f32 %v4071_v24, %v4032_v4  ;;  %v1019_v28 = vmul.f32 %v4071_v24, %v4026_v54  ;;  %v1020_v19 = vmul.f32 %v4071_v24, %v4022_v51 }
 0x6a2   : > { %v1021_v20 = vmul.f32 %v4071_v24, %v4019_v49 }
 0x6a3   : > { %v1031_v29 = vadd.f32 %v1030_v26, %v3959_v44  ;;  %v1210_v30 = vpack.c.bf16 %v1019_v28, %v1018_v27 }
 0x6a4   : > { %v1211_v21 = vpack.c.bf16 %v1021_v20, %v1020_v19 }
 0x6a5   : > { %3431 = vmatprep.subr.msk.mxu0 %vm542_vm3, %v1031_v29  ;;  %3453 = vmatprep.mubr.msk.bf16.mxu1 %vm665_vm4, %v1210_v30 }
 0x6a6   : > { %3432 = vmatpush3.msk.msra.mxu0 %vm542_vm3, %v1031_v29 }
 0x71d   : > { %v1050_v31 = vpop.trf.xlu0 }
 0x71e   : > { %3433 = vmatprep.mubr.msk.f32.mxu0 %vm517_vm5, %v1050_v31 }
 0x721   : > { %v1051_v32 = vpop.trf.xlu0 }
 0x722   : > { %3434 = vmatmul.mubr.msk.f32.vlgmr.msra.gmra.mxu0 %vm517_vm5, %v1051_v32 }
 0x725   : > { %v1052_v33 = vpop.trf.xlu0 }
 0x726   : > { %3436 = vmatprep.mubr.msk.f32.mxu0 %vm517_vm5, %v1052_v33 }
 0x729   : > { %v1053_v35 = vpop.trf.xlu0 }
 0x72a   : > { %3437 = vmatmul.mubr.msk.f32.gmra.mxu0 %vm517_vm5, %v1053_v35 }
 0x72d   : > { %v1054_v36 = vpop.trf.xlu0 }
 0x72e   : > { %3439 = vmatprep.mubr.msk.f32.mxu0 %vm517_vm5, %v1054_v36 }
 0x731   : > { %v1055_v37 = vpop.trf.xlu0 }
 0x732   : > { %3440 = vmatmul.mubr.msk.f32.gmra.mxu0 %vm517_vm5, %v1055_v37 }
 0x735   : > { %v1056_v38 = vpop.trf.xlu0 }
 0x736   : > { %3442 = vmatprep.mubr.msk.f32.mxu0 %vm517_vm5, %v1056_v38 }
 0x739   : > { %v1057_v48 = vpop.trf.xlu0 }
 0x73a   : > { %3443 = vmatmul.mubr.msk.f32.gmra.mxu0 %vm517_vm5, %v1057_v48 }
 0x73b   : > { %3465 = vmatprep.mubr.msk.bf16.mxu0 %vm665_vm4, %v1279_v50 }
 0x7e2   : > { %v3435_v42 = vpop.f32.mrf.mxu0 }
 0x7e4   : > { %v1159_v52 = vpop.f32.mrf.mxu0 }
 0x7ea   : > { %v3438_v53 = vpop.f32.mrf.mxu0 }
 0x7ec   : > { %v1169_v3 = vpop.f32.mrf.mxu0 }
 0x7f2   : > { %v3441_v6 = vpop.f32.mrf.mxu0 }
 0x7f4   : > { %v1179_v9 = vpop.f32.mrf.mxu0 }
 0x7f5   : > { %3718 = vtanh.f32 %v1179_v9 }
 0x7fa   : > { %v3444_v40 = vpop.f32.mrf.mxu0 }
 0x7fb   : > { %3720 = vtanh.f32 %v3444_v40 }
 0x7fc   : > { %v1189_v2 = vpop.f32.mrf.mxu0 }
 0x7fd   : > { %3722 = vtanh.f32 %v1189_v2 }
 0x7fe   : > { %3724 = vtanh.f32 %v3441_v6 }
 0x7ff   : > { %3726 = vtanh.f32 %v1169_v3 }
 0x800   : > { %3728 = vtanh.f32 %v3438_v53 }
 0x801   : > { %3730 = vtanh.f32 %v1159_v52 }
 0x802   : > { %3732 = vtanh.f32 %v3435_v42  ;;  %v3719_v7 = vpop.eup %3718 }
 0x808   : > { %v3721_v46 = vpop.eup %3720 }
 0x80a   : > { %v3723_v55 = vpop.eup %3722 }
 0x80b   : > { %v1209_v56 = vpack.c.bf16 %v3721_v46, %v3723_v55  ;;  %v3725_v57 = vpop.eup %3724 }
 0x80c   : > { %v1208_v59 = vpack.c.bf16 %v3725_v57, %v3719_v7  ;;  %v3727_v60 = vpop.eup %3726 }
 0x80d   : > { %3653 = vmatprep.subr.msk.bf16.mxu1 %vm665_vm4, %v1209_v56  ;;  %3457 = vmatprep.subr.bf16.mxu0 %v1209_v56  ;;  %v1228_v58 = vsel %vm665_vm4, %v1209_v56, 0  ;;  %v3729_v61 = vpop.eup %3728 }
 0x80e   : > { %3446 = vmatpush3.bf16.xpose.msra.mxu1 %v1228_v58  ;;  %3458 = vmatpush3.bf16.msra.mxu0 %v1209_v56  ;;  %v1207_v62 = vpack.c.bf16 %v3729_v61, %v3727_v60  ;;  %v3731_v63 = vpop.eup %3730  ;;  %v1225_v12 = vsel %vm665_vm4, %v1208_v59, 0 }
 0x80f   : > { %3654 = vmatprep.subr.msk.bf16.mxu1 %vm665_vm4, %v1208_v59  ;;  %3459 = vmatprep.subr.bf16.mxu0 %v1208_v59  ;;  %v3733_v11 = vpop.eup %3732 }
 0x810   : > { %v1206_v13 = vpack.c.bf16 %v3733_v11, %v3731_v63  ;;  %v1222_v17 = vsel %vm665_vm4, %v1207_v62, 0 }
 0x812   : > { %3460 = vmatpush3.bf16.msra.mxu0 %v1208_v59  ;;  %v1219_v18 = vsel %vm665_vm4, %v1206_v13, 0 }
 0x813   : > { %3461 = vmatprep.subr.bf16.mxu0 %v1207_v62 }
 0x816   : > { %3448 = vmatpush3.bf16.xpose.msra.mxu1 %v1225_v12  ;;  %3462 = vmatpush3.bf16.msra.mxu0 %v1207_v62 }
 0x817   : > { %3655 = vmatprep.subr.msk.bf16.mxu1 %vm665_vm4, %v1207_v62  ;;  %3463 = vmatprep.subr.bf16.mxu0 %v1206_v13 }
 0x81a   : > { %3464 = vmatpush3.bf16.msra.mxu0 %v1206_v13 }
 0x81b   : > { %3469 = vmatprep.subr.mxu0 %v3832_v0 }
 0x81d   : > { %3466 = vmatmul.mubr.msk.bf16.vlgmr.msra.gmra.mxu0 %vm665_vm4, %v1280_v16 }
 0x81e   : > { %3450 = vmatpush3.bf16.xpose.msra.mxu1 %v1222_v17  ;;  %3477 = vmatprep.mubr.msk.f32.mxu0 %vm3833_vm0, %v3832_v0 }
 0x81f   : > { %3656 = vmatprep.subr.msk.bf16.mxu1 %vm665_vm4, %v1206_v13 }
 0x826   : > { %3452 = vmatpush3.bf16.xpose.msra.mxu1 %v1219_v18 }
 0x82d   : > { %3454 = vmatmul.mubr.msk.bf16.vlgmr.msra.gmra.mxu1 %vm665_vm4, %v1211_v21 }
 0x8dd   : > { %v3467_v22 = vpop.f32.mrf.mxu0 }
 0x8de   : > { %v1361_v28 = vmul.f32 %v3467_v22, %v3467_v22 }
 0x8df   : > { %v4117_v23 = vpop.f32.mrf.mxu0 }
 0x8e0   : > { %v1359_v26 = vmul.f32 %v4117_v23, %v4117_v23  ;;  %v1366_v24 = vsel %vm665_vm4, %v1361_v28, 0.0 }
 0x8e1   : > { %v3468_v25 = vpop.f32.mrf.mxu0 }
 0x8e2   : > { %v1363_v30 = vsel %vm665_vm4, %v1359_v26, 0.0  ;;  %v1362_v33 = vmul.f32 %v3468_v25, %v3468_v25 }
 0x8e3   : > { %v1324_v27 = vpop.f32.mrf.mxu0 }
 0x8e4   : > { %v1360_v29 = vmul.f32 %v1324_v27, %v1324_v27  ;;  %v1368_v36 = vsel %vm665_vm4, %v1362_v33, 0.0 }
 0x8e6   : > { %v1364_v31 = vsel %vm665_vm4, %v1360_v29, 0.0 }
 0x8e7   : > { %v1365_v32 = vadd.f32 %v1364_v31, %v1363_v30 }
 0x8e9   : > { %v1367_v35 = vadd.f32 %v1366_v24, %v1365_v32 }
 0x8eb   : > { %v1369_v37 = vadd.f32 %v1368_v36, %v1367_v35 }
 0x8ed   : > { %v3455_v38 = vpop.f32.mrf.mxu1  ;;  %v1370_v47 = vrot.slane %v1369_v37, 4 }
 0x8ee   : > { %v1338_v52 = vmul.f32 %v3455_v38, %v3455_v38 }
 0x8ef   : > { %v1264_v45 = vpop.f32.mrf.mxu1  ;;  %v1371_v3 = vadd.f32 %v1370_v47, %v1369_v37 }
 0x8f0   : > { %v1336_v50 = vmul.f32 %v1264_v45, %v1264_v45  ;;  %v1343_v7 = vsel %vm665_vm4, %v1338_v52, 0.0 }
 0x8f1   : > { %v3456_v48 = vpop.f32.mrf.mxu1  ;;  %v1372_v46 = vrot.slane %v1371_v3, 2 }
 0x8f2   : > { %v1340_v6 = vsel %vm665_vm4, %v1336_v50, 0.0  ;;  %v1339_v9 = vmul.f32 %v3456_v48, %v3456_v48 }
 0x8f3   : > { %v1267_v42 = vpop.f32.mrf.mxu1  ;;  %v1373_v58 = vadd.f32 %v1372_v46, %v1371_v3 }
 0x8f4   : > { %v1337_v53 = vmul.f32 %v1267_v42, %v1267_v42  ;;  %v1345_v56 = vsel %vm665_vm4, %v1339_v9, 0.0 }
 0x8f5   : > { %v1374_v61 = vrot.slane %v1373_v58, 1 }
 0x8f6   : > { %v1341_v40 = vsel %vm665_vm4, %v1337_v53, 0.0 }
 0x8f7   : > { %v1342_v2 = vadd.f32 %v1341_v40, %v1340_v6  ;;  %v1375_v11 = vadd.f32 %v1374_v61, %v1373_v58 }
 0x8f9   : > { %v1344_v55 = vadd.f32 %v1343_v7, %v1342_v2  ;;  %v1376_v14 = vmax.f32 %v1375_v11, 1e-24 }
 0x8fb   : > { %v1346_v57 = vadd.f32 %v1345_v56, %v1344_v55 }
 0x8fd   : > { %v1347_v59 = vrot.slane %v1346_v57, 4 }
 0x8ff   : > { %v1348_v60 = vadd.f32 %v1347_v59, %v1346_v57 }
 0x901   : > { %v1349_v62 = vrot.slane %v1348_v60, 2 }
 0x903   : > { %v1350_v63 = vadd.f32 %v1349_v62, %v1348_v60 }
 0x905   : > { %v1351_v12 = vrot.slane %v1350_v63, 1 }
 0x907   : > { %v1352_v13 = vadd.f32 %v1351_v12, %v1350_v63 }
 0x909   : > { %v1353_v15 = vmax.f32 %v1352_v13, 1e-24 }
 0x90b   : > { %3734 = vrsqrt.f32 %v1353_v15 }
 0x90c   : > { %3736 = vrsqrt.f32 %v1376_v14 }
 0x918   : > { %v3735_v16 = vpop.eup %3734 }
 0x919   : > { %v1356_v17 = vmul.f32 %v3735_v16, %v1267_v42  ;;  %v1358_v18 = vmul.f32 %v3735_v16, %v3456_v48  ;;  %v1357_v19 = vmul.f32 %v3735_v16, %v3455_v38  ;;  %v3737_v20 = vpop.eup %3736  ;;  %v1355_v28 = vmul.f32 %v3735_v16, %v1264_v45 }
 0x91a   : > { %v1381_v31 = vmul.f32 %v3737_v20, %v3468_v25  ;;  %v1380_v33 = vmul.f32 %v3737_v20, %v3467_v22  ;;  %v1379_v35 = vmul.f32 %v3737_v20, %v1324_v27 }
 0x91b   : > { %v1385_v21 = vadd.f32 %v1358_v18, %v4019_v49  ;;  %v1384_v26 = vadd.f32 %v1357_v19, %v4022_v51  ;;  %v1383_v29 = vadd.f32 %v1356_v17, %v4026_v54  ;;  %v1382_v24 = vadd.f32 %v1355_v28, %v4032_v4 }
 0x91c   : > { %v1393_v49 = vadd.f32 %v1381_v31, %v4039_v43  ;;  %v1392_v54 = vadd.f32 %v1380_v33, %v4045_v1  ;;  %v1378_v4 = vmul.f32 %v3737_v20, %v4117_v23  ;;  %v1391_v22 = vadd.f32 %v1379_v35, %v4051_v5 }
 0x91d   : > { %v4132_v30 = vmax.f32 %v1385_v21, 0.0  ;;  %v4135_v32 = vmax.f32 %v1384_v26, 0.0  ;;  %v4139_v36 = vmax.f32 %v1383_v29, 0.0  ;;  %v4145_v51 = vmax.f32 %v1382_v24, 0.0 }
 0x91e   : > { %v4152_v25 = vmax.f32 %v1393_v49, 0.0  ;;  %v4158_v43 = vmax.f32 %v1392_v54, 0.0  ;;  %v1390_v1 = vadd.f32 %v1378_v4, %v4056_v41  ;;  %v4164_v5 = vmax.f32 %v1391_v22, 0.0 }
 0x91f   : > { %3470 = vmatpush3.msra.mxu0 %v4132_v30 }
 0x920   : > { %3471 = vmatprep.subr.mxu0 %v3832_v0 }
 0x921   : > { %3472 = vmatpush3.msra.mxu0 %v4135_v32 }
 0x922   : > { %3473 = vmatprep.subr.mxu0 %v3832_v0 }
 0x923   : > { %3474 = vmatpush3.msra.mxu0 %v4139_v36 }
 0x924   : > { %3475 = vmatprep.subr.mxu0 %v3832_v0 }
 0x925   : > { %3476 = vmatpush3.msra.mxu0 %v4145_v51 }
 0x926   : > { %3478 = vmatmul.mubr.msk.f32.vlgmr.msra.gmra.mxu0 %vm295_vm1, %v3928_v10  ;;  %3480 = vmatprep.subr.mxu0 %v3832_v0  ;;  %v4169_v10 = vmax.f32 %v1390_v1, 0.0 }
 0x927   : > { %3481 = vmatpush3.msra.mxu0 %v4152_v25  ;;  %3488 = vmatprep.mubr.msk.f32.mxu0 %vm3833_vm0, %v3832_v0 }
 0x928   : > { %3482 = vmatprep.subr.mxu0 %v3832_v0 }
 0x929   : > { %3483 = vmatpush3.msra.mxu0 %v4158_v43 }
 0x92a   : > { %3484 = vmatprep.subr.mxu0 %v3832_v0 }
 0x92b   : > { %3485 = vmatpush3.msra.mxu0 %v4164_v5 }
 0x92c   : > { %3486 = vmatprep.subr.mxu0 %v3832_v0 }
 0x92d   : > { %3487 = vmatpush3.msra.mxu0 %v4169_v10 }
 0x92e   : > { %3489 = vmatmul.mubr.msk.f32.vlgmr.msra.gmra.mxu0 %vm295_vm1, %v3919_v8 }
 0x9e6   : > { %v1464_v41 = vpop.f32.mrf.mxu0 }
 0x9e7   : > { %v1538_v45 = vsel %vm442_vm2, %v1464_v41, -inf }
 0x9e8   : > { %v3479_v23 = vpop.f32.mrf.mxu0 }
 0x9ee   : > { %v1534_v27 = vpop.f32.mrf.mxu0 }
 0x9ef   : > { %v1549_v37 = vsel %vm442_vm2, %v1534_v27, -inf }
 0x9f0   : > { %1550 = vmax.xlane.f32.xlu1 %v1549_v37  ;;  %v3490_v38 = vpop.f32.mrf.mxu0 }
 0x9f4   : > { %1539 = vmax.xlane.f32.xlu1 %v1538_v45 }
 0xa79   : > { %v1551_v47 = vpop.xlane.xlu1 %1550 }
 0xa7a   : > { %v1552_v48 = vsub.f32 %v1534_v27, %v1551_v47 }
 0xa7c   : > { %v1553_v50 = vmul.f32 1.442695, %v1552_v48 }
 0xa7d   : > { %v1540_v42 = vpop.xlane.xlu1 %1539 }
 0xa7e   : > { %3738 = vpow2.f32 %v1553_v50  ;;  %v1541_v52 = vsub.f32 %v1464_v41, %v1540_v42 }
 0xa80   : > { %v1542_v53 = vmul.f32 1.442695, %v1541_v52 }
 0xa82   : > { %3740 = vpow2.f32 %v1542_v53 }
 0xa8b   : > { %v3739_v3 = vpop.eup %3738 }
 0xa8c   : > { %v1555_v8 = vsel %vm442_vm2, %v3739_v3, 0.0 }
 0xa8d   : > { %1556 = vadd.xlane.f32.xlu1 %v1555_v8 }
 0xa8f   : > { %v3741_v6 = vpop.eup %3740 }
 0xa90   : > { %v1544_v9 = vsel %vm442_vm2, %v3741_v6, 0.0 }
 0xa91   : > { %1545 = vadd.xlane.f32.xlu0 %v1544_v9 }
 0xb16   : > { %v1557_v40 = vpop.xlane.xlu1 %1556 }
 0xb17   : > { %3742 = vrcp.f32 %v1557_v40 }
 0xb1a   : > { %v1546_v2 = vpop.xlane.xlu0 %1545 }
 0xb1b   : > { %3744 = vrcp.f32 %v1546_v2 }
 0xb24   : > { %v3743_v7 = vpop.eup %3742 }
 0xb25   : > { %v1559_v46 = vmul.f32 %v3743_v7, %v3739_v3 }
 0xb27   : > { %v4180_v55 = vrot.slane %v1559_v46, %v3947_v34 }
 0xb28   : > { %v3745_v56 = vpop.eup %3744 }
 0xb29   : > { %v1548_v57 = vmul.f32 %v3745_v56, %v3741_v6  ;;  %v1578_v58 = vmul.f32 %v4180_v55, %v1534_v27  ;;  %v1572_v59 = vmul.f32 %v4180_v55, %v4169_v10  ;;  %v1573_v60 = vmul.f32 %v4180_v55, %v4164_v5 }
 0xb2a   : > { %v1574_v3 = vmul.f32 %v4180_v55, %v4158_v43  ;;  %v1575_v8 = vmul.f32 %v4180_v55, %v4152_v25 }
 0xb2b   : > { %v4188_v61 = vrot.slane %v1548_v57, %v3947_v34  ;;  %v1579_v62 = vadd.f32 %v1578_v58, %v3952_v39  ;;  %v1825_v63 = vpack.c.bf16 %v1573_v60, %v1572_v59 }
 0xb2c   : > { %v1826_v6 = vpack.c.bf16 %v1575_v8, %v1574_v3 }
 0xb2d   : > { %1580 = vxpose.xlu1.b32.start.end [1/1] (short) (narrow) %v1579_v62, 64  ;;  %3525 = vmatprep.mubr.msk.bf16.mxu1 %vm665_vm4, %v1825_v63  ;;  %v1576_v11 = vmul.f32 %v4188_v61, %v1464_v41  ;;  %v1564_v20 = vmul.f32 %v4188_v61, %v4145_v51  ;;  %v1565_v21 = vmul.f32 %v4188_v61, %v4139_v36 }
 0xb2e   : > { %v1566_v2 = vmul.f32 %v4188_v61, %v4135_v32  ;;  %v1567_v7 = vmul.f32 %v4188_v61, %v4132_v30 }
 0xb2f   : > { %v1577_v12 = vadd.f32 %v1576_v11, %v3959_v44  ;;  %v1756_v28 = vpack.c.bf16 %v1565_v21, %v1564_v20 }
 0xb30   : > { %v1757_v46 = vpack.c.bf16 %v1567_v7, %v1566_v2 }
 0xb31   : > { %3491 = vmatprep.subr.msk.mxu0 %vm542_vm3, %v1577_v12 }
 0xb32   : > { %3492 = vmatpush3.msk.msra.mxu0 %vm542_vm3, %v1577_v12 }
 0xba9   : > { %v1596_v13 = vpop.trf.xlu1 }
 0xbaa   : > { %3493 = vmatprep.mubr.msk.f32.mxu0 %vm517_vm5, %v1596_v13 }
 0xbad   : > { %v1597_v14 = vpop.trf.xlu1 }
 0xbae   : > { %3494 = vmatmul.mubr.msk.f32.vlgmr.msra.gmra.mxu0 %vm517_vm5, %v1597_v14 }
 0xbb1   : > { %v1598_v15 = vpop.trf.xlu1 }
 0xbb2   : > { %3496 = vmatprep.mubr.msk.f32.mxu0 %vm517_vm5, %v1598_v15 }
 0xbb5   : > { %v1599_v16 = vpop.trf.xlu1 }
 0xbb6   : > { %3497 = vmatmul.mubr.msk.f32.gmra.mxu0 %vm517_vm5, %v1599_v16 }
 0xbb9   : > { %v1600_v17 = vpop.trf.xlu1 }
 0xbba   : > { %3499 = vmatprep.mubr.msk.f32.mxu0 %vm517_vm5, %v1600_v17 }
 0xbbd   : > { %v1601_v18 = vpop.trf.xlu1 }
 0xbbe   : > { %3500 = vmatmul.mubr.msk.f32.gmra.mxu0 %vm517_vm5, %v1601_v18 }
 0xbc1   : > { %v1602_v19 = vpop.trf.xlu1 }
 0xbc2   : > { %3502 = vmatprep.mubr.msk.f32.mxu0 %vm517_vm5, %v1602_v19 }
 0xbc5   : > { %v1603_v26 = vpop.trf.xlu1 }
 0xbc6   : > { %3503 = vmatmul.mubr.msk.f32.gmra.mxu0 %vm517_vm5, %v1603_v26 }
 0xbc7   : > { %3513 = vmatprep.mubr.msk.bf16.mxu0 %vm665_vm4, %v1756_v28 }
 0xc6e   : > { %v3495_v29 = vpop.f32.mrf.mxu0 }
 0xc70   : > { %v1705_v31 = vpop.f32.mrf.mxu0 }
 0xc76   : > { %v3498_v24 = vpop.f32.mrf.mxu0 }
 0xc78   : > { %v1715_v33 = vpop.f32.mrf.mxu0 }
 0xc7e   : > { %v3501_v35 = vpop.f32.mrf.mxu0 }
 0xc80   : > { %v1725_v49 = vpop.f32.mrf.mxu0 }
 0xc81   : > { %3746 = vtanh.f32 %v1725_v49 }
 0xc86   : > { %v3504_v54 = vpop.f32.mrf.mxu0 }
 0xc87   : > { %3748 = vtanh.f32 %v3504_v54 }
 0xc88   : > { %v1735_v4 = vpop.f32.mrf.mxu0 }
 0xc89   : > { %3750 = vtanh.f32 %v1735_v4 }
 0xc8a   : > { %3752 = vtanh.f32 %v3501_v35 }
 0xc8b   : > { %3754 = vtanh.f32 %v1715_v33 }
 0xc8c   : > { %3756 = vtanh.f32 %v3498_v24 }
 0xc8d   : > { %3758 = vtanh.f32 %v1705_v31 }
 0xc8e   : > { %3760 = vtanh.f32 %v3495_v29  ;;  %v3747_v22 = vpop.eup %3746 }
 0xc94   : > { %v3749_v1 = vpop.eup %3748 }
 0xc96   : > { %v3751_v41 = vpop.eup %3750 }
 0xc97   : > { %v1755_v23 = vpack.c.bf16 %v3749_v1, %v3751_v41  ;;  %v3753_v27 = vpop.eup %3752 }
 0xc98   : > { %v1754_v38 = vpack.c.bf16 %v3753_v27, %v3747_v22  ;;  %v3755_v45 = vpop.eup %3754 }
 0xc99   : > { %3657 = vmatprep.subr.msk.bf16.mxu0 %vm665_vm4, %v1755_v23  ;;  %3517 = vmatprep.subr.bf16.mxu1 %v1755_v23  ;;  %v1774_v37 = vsel %vm665_vm4, %v1755_v23, 0  ;;  %v3757_v47 = vpop.eup %3756 }
 0xc9a   : > { %3506 = vmatpush3.bf16.xpose.msra.mxu0 %v1774_v37  ;;  %3518 = vmatpush3.bf16.msra.mxu1 %v1755_v23  ;;  %v1753_v48 = vpack.c.bf16 %v3757_v47, %v3755_v45  ;;  %v3759_v50 = vpop.eup %3758  ;;  %v1771_v52 = vsel %vm665_vm4, %v1754_v38, 0 }
 0xc9b   : > { %3658 = vmatprep.subr.msk.bf16.mxu0 %vm665_vm4, %v1754_v38  ;;  %3519 = vmatprep.subr.bf16.mxu1 %v1754_v38  ;;  %v3761_v42 = vpop.eup %3760 }
 0xc9c   : > { %v1752_v53 = vpack.c.bf16 %v3761_v42, %v3759_v50  ;;  %v1768_v9 = vsel %vm665_vm4, %v1753_v48, 0 }
 0xc9e   : > { %3520 = vmatpush3.bf16.msra.mxu1 %v1754_v38  ;;  %v1765_v40 = vsel %vm665_vm4, %v1752_v53, 0 }
 0xc9f   : > { %3521 = vmatprep.subr.bf16.mxu1 %v1753_v48 }
 0xca2   : > { %3508 = vmatpush3.bf16.xpose.msra.mxu0 %v1771_v52  ;;  %3522 = vmatpush3.bf16.msra.mxu1 %v1753_v48 }
 0xca3   : > { %3659 = vmatprep.subr.msk.bf16.mxu0 %vm665_vm4, %v1753_v48  ;;  %3523 = vmatprep.subr.bf16.mxu1 %v1752_v53 }
 0xca6   : > { %3524 = vmatpush3.bf16.msra.mxu1 %v1752_v53 }
 0xca7   : > { %3529 = vmatprep.subr.mxu1 %v3832_v0 }
 0xca9   : > { %3526 = vmatmul.mubr.msk.bf16.vlgmr.msra.gmra.mxu1 %vm665_vm4, %v1826_v6 }
 0xcaa   : > { %3510 = vmatpush3.bf16.xpose.msra.mxu0 %v1768_v9  ;;  %3537 = vmatprep.mubr.msk.f32.mxu1 %vm3833_vm0, %v3832_v0 }
 0xcab   : > { %3660 = vmatprep.subr.msk.bf16.mxu0 %vm665_vm4, %v1752_v53 }
 0xcb2   : > { %3512 = vmatpush3.bf16.xpose.msra.mxu0 %v1765_v40 }
 0xcb9   : > { %3514 = vmatmul.mubr.msk.bf16.vlgmr.msra.gmra.mxu0 %vm665_vm4, %v1757_v46 }
 0xd69   : > { %v3527_v55 = vpop.f32.mrf.mxu1 }
 0xd6a   : > { %v1907_v60 = vmul.f32 %v3527_v55, %v3527_v55 }
 0xd6b   : > { %v4230_v56 = vpop.f32.mrf.mxu1 }
 0xd6c   : > { %v1905_v58 = vmul.f32 %v4230_v56, %v4230_v56  ;;  %v1912_v61 = vsel %vm665_vm4, %v1907_v60, 0.0 }
 0xd6d   : > { %v3528_v57 = vpop.f32.mrf.mxu1 }
 0xd6e   : > { %v1909_v63 = vsel %vm665_vm4, %v1905_v58, 0.0  ;;  %v1908_v13 = vmul.f32 %v3528_v57, %v3528_v57 }
 0xd6f   : > { %v1870_v59 = vpop.f32.mrf.mxu1 }
 0xd70   : > { %v1906_v62 = vmul.f32 %v1870_v59, %v1870_v59  ;;  %v1914_v15 = vsel %vm665_vm4, %v1908_v13, 0.0 }
 0xd72   : > { %v1910_v11 = vsel %vm665_vm4, %v1906_v62, 0.0 }
 0xd73   : > { %v1911_v12 = vadd.f32 %v1910_v11, %v1909_v63 }
 0xd75   : > { %v1913_v14 = vadd.f32 %v1912_v61, %v1911_v12 }
 0xd77   : > { %v1915_v16 = vadd.f32 %v1914_v15, %v1913_v14 }
 0xd79   : > { %v3515_v17 = vpop.f32.mrf.mxu0  ;;  %v1916_v19 = vrot.slane %v1915_v16, 4 }
 0xd7a   : > { %v1884_v28 = vmul.f32 %v3515_v17, %v3515_v17 }
 0xd7b   : > { %v1810_v18 = vpop.f32.mrf.mxu0  ;;  %v1917_v31 = vadd.f32 %v1916_v19, %v1915_v16 }
 0xd7c   : > { %v1882_v21 = vmul.f32 %v1810_v18, %v1810_v18  ;;  %v1889_v54 = vsel %vm665_vm4, %v1884_v28, 0.0 }
 0xd7d   : > { %v3516_v20 = vpop.f32.mrf.mxu0  ;;  %v1918_v4 = vrot.slane %v1917_v31, 2 }
 0xd7e   : > { %v1886_v24 = vsel %vm665_vm4, %v1882_v21, 0.0  ;;  %v1885_v33 = vmul.f32 %v3516_v20, %v3516_v20 }
 0xd7f   : > { %v1813_v26 = vpop.f32.mrf.mxu0  ;;  %v1919_v23 = vadd.f32 %v1918_v4, %v1917_v31 }
 0xd80   : > { %v1883_v29 = vmul.f32 %v1813_v26, %v1813_v26  ;;  %v1891_v1 = vsel %vm665_vm4, %v1885_v33, 0.0 }
 0xd81   : > { %v1920_v38 = vrot.slane %v1919_v23, 1 }
 0xd82   : > { %v1887_v35 = vsel %vm665_vm4, %v1883_v29, 0.0 }
 0xd83   : > { %v1888_v49 = vadd.f32 %v1887_v35, %v1886_v24  ;;  %v1921_v48 = vadd.f32 %v1920_v38, %v1919_v23 }
 0xd85   : > { %v1890_v22 = vadd.f32 %v1889_v54, %v1888_v49  ;;  %v1922_v52 = vmax.f32 %v1921_v48, 1e-24 }
 0xd87   : > { %v1892_v41 = vadd.f32 %v1891_v1, %v1890_v22 }
 0xd89   : > { %v1893_v27 = vrot.slane %v1892_v41, 4 }
 0xd8b   : > { %v1894_v37 = vadd.f32 %v1893_v27, %v1892_v41 }
 0xd8d   : > { %v1895_v45 = vrot.slane %v1894_v37, 2 }
 0xd8f   : > { %v1896_v47 = vadd.f32 %v1895_v45, %v1894_v37 }
 0xd91   : > { %v1897_v50 = vrot.slane %v1896_v47, 1 }
 0xd93   : > { %v1898_v42 = vadd.f32 %v1897_v50, %v1896_v47 }
 0xd95   : > { %v1899_v53 = vmax.f32 %v1898_v42, 1e-24 }
 0xd97   : > { %3762 = vrsqrt.f32 %v1899_v53 }
 0xd98   : > { %3764 = vrsqrt.f32 %v1922_v52 }
 0xda4   : > { %v3763_v3 = vpop.eup %3762 }
 0xda5   : > { %v1902_v8 = vmul.f32 %v3763_v3, %v1813_v26  ;;  %v1904_v6 = vmul.f32 %v3763_v3, %v3516_v20  ;;  %v1903_v9 = vmul.f32 %v3763_v3, %v3515_v17  ;;  %v3765_v40 = vpop.eup %3764  ;;  %v1901_v46 = vmul.f32 %v3763_v3, %v1810_v18 }
 0xda6   : > { %v1927_v62 = vmul.f32 %v3765_v40, %v3528_v57  ;;  %v1926_v12 = vmul.f32 %v3765_v40, %v3527_v55  ;;  %v1925_v61 = vmul.f32 %v3765_v40, %v1870_v59 }
 0xda7   : > { %v1931_v2 = vadd.f32 %v1904_v6, %v4132_v30  ;;  %v1930_v7 = vadd.f32 %v1903_v9, %v4135_v32  ;;  %v1929_v58 = vadd.f32 %v1902_v8, %v4139_v36  ;;  %v1928_v11 = vadd.f32 %v1901_v46, %v4145_v51 }
 0xda8   : > { %v1939_v30 = vadd.f32 %v1927_v62, %v4152_v25  ;;  %v1938_v36 = vadd.f32 %v1926_v12, %v4158_v43  ;;  %v1924_v51 = vmul.f32 %v3765_v40, %v4230_v56  ;;  %v1937_v55 = vadd.f32 %v1925_v61, %v4164_v5  ;;  %v4270_v25 = vld [vmem:[%s4521_s2] sm:$0x7] }
 0xda9   : > { %v4245_v60 = vmax.f32 %v1931_v2, 0.0  ;;  %v4248_v63 = vmax.f32 %v1930_v7, 0.0  ;;  %v4252_v13 = vmax.f32 %v1929_v58, 0.0  ;;  %v4258_v32 = vmax.f32 %v1928_v11, 0.0 }
 0xdaa   : > { %v4265_v57 = vmax.f32 %v1939_v30, 0.0  ;;  %v4276_v43 = vmax.f32 %v1938_v36, 0.0  ;;  %v1936_v5 = vadd.f32 %v1924_v51, %v4169_v10  ;;  %v4282_v56 = vmax.f32 %v1937_v55, 0.0  ;;  %v4294_v10 = vld [vmem:[%s4522_s3] sm:$0x7] }
 0xdab   : > { %3530 = vmatpush3.msra.mxu1 %v4245_v60 }
 0xdac   : > { %3531 = vmatprep.subr.mxu1 %v3832_v0  ;;  %v4287_v59 = vmax.f32 %v1936_v5, 0.0 }
 0xdad   : > { %3532 = vmatpush3.msra.mxu1 %v4248_v63 }
 0xdae   : > { %3533 = vmatprep.subr.mxu1 %v3832_v0 }
 0xdaf   : > { %3534 = vmatpush3.msra.mxu1 %v4252_v13 }
 0xdb0   : > { %3535 = vmatprep.subr.mxu1 %v3832_v0 }
 0xdb1   : > { %3536 = vmatpush3.msra.mxu1 %v4258_v32 }
 0xdb2   : > { %3538 = vmatmul.mubr.msk.f32.vlgmr.msra.gmra.mxu1 %vm295_vm1, %v4270_v25  ;;  %3540 = vmatprep.subr.mxu1 %v3832_v0 }
 0xdb3   : > { %3541 = vmatpush3.msra.mxu1 %v4265_v57  ;;  %3548 = vmatprep.mubr.msk.f32.mxu1 %vm3833_vm0, %v3832_v0 }
 0xdb4   : > { %3542 = vmatprep.subr.mxu1 %v3832_v0 }
 0xdb5   : > { %3543 = vmatpush3.msra.mxu1 %v4276_v43 }
 0xdb6   : > { %3544 = vmatprep.subr.mxu1 %v3832_v0 }
 0xdb7   : > { %3545 = vmatpush3.msra.mxu1 %v4282_v56 }
 0xdb8   : > { %3546 = vmatprep.subr.mxu1 %v3832_v0 }
 0xdb9   : > { %3547 = vmatpush3.msra.mxu1 %v4287_v59 }
 0xdba   : > { %3549 = vmatmul.mubr.msk.f32.vlgmr.msra.gmra.mxu1 %vm295_vm1, %v4294_v10 }
 0xe72   : > { %v2010_v14 = vpop.f32.mrf.mxu1 }
 0xe73   : > { %v2084_v15 = vsel %vm442_vm2, %v2010_v14, -inf }
 0xe74   : > { %2085 = vmax.xlane.f32.xlu0 %v2084_v15  ;;  %v3539_v16 = vpop.f32.mrf.mxu1 }
 0xe7a   : > { %v2080_v17 = vpop.f32.mrf.mxu1 }
 0xe7b   : > { %v2095_v18 = vsel %vm442_vm2, %v2080_v17, -inf }
 0xe7c   : > { %2096 = vmax.xlane.f32.xlu1 %v2095_v18  ;;  %v3550_v19 = vpop.f32.mrf.mxu1 }
 0xefd   : > { %v2086_v20 = vpop.xlane.xlu0 %2085 }
 0xefe   : > { %v2087_v21 = vsub.f32 %v2010_v14, %v2086_v20 }
 0xf00   : > { %v2088_v29 = vmul.f32 1.442695, %v2087_v21 }
 0xf05   : > { %v2097_v26 = vpop.xlane.xlu1 %2096 }
 0xf06   : > { %v2098_v28 = vsub.f32 %v2080_v17, %v2097_v26 }
 0xf08   : > { %v2099_v31 = vmul.f32 1.442695, %v2098_v28 }
 0xf0a   : > { %3766 = vpow2.f32 %v2099_v31 }
 0xf0b   : > { %3768 = vpow2.f32 %v2088_v29 }
 0xf17   : > { %v3767_v24 = vpop.eup %3766 }
 0xf18   : > { %v2101_v33 = vsel %vm442_vm2, %v3767_v24, 0.0  ;;  %v3769_v35 = vpop.eup %3768 }
 0xf19   : > { %2102 = vadd.xlane.f32.xlu0 %v2101_v33  ;;  %v2090_v49 = vsel %vm442_vm2, %v3769_v35, 0.0 }
 0xf1d   : > { %2091 = vadd.xlane.f32.xlu0 %v2090_v49 }
 0xfa2   : > { %v2103_v54 = vpop.xlane.xlu0 %2102 }
 0xfa3   : > { %3770 = vrcp.f32 %v2103_v54 }
 0xfa6   : > { %v2092_v4 = vpop.xlane.xlu0 %2091 }
 0xfa7   : > { %3772 = vrcp.f32 %v2092_v4 }
 0xfb0   : > { %v3771_v22 = vpop.eup %3770 }
 0xfb1   : > { %v2105_v1 = vmul.f32 %v3771_v22, %v3767_v24 }
 0xfb3   : > { %v4303_v41 = vrot.slane %v2105_v1, %v3947_v34 }
 0xfb4   : > { %v3773_v23 = vpop.eup %3772 }
 0xfb5   : > { %v2094_v27 = vmul.f32 %v3773_v23, %v3769_v35  ;;  %v2124_v37 = vmul.f32 %v4303_v41, %v2080_v17  ;;  %v2118_v7 = vmul.f32 %v4303_v41, %v4287_v59  ;;  %v2119_v46 = vmul.f32 %v4303_v41, %v4282_v56 }
 0xfb6   : > { %v2120_v35 = vmul.f32 %v4303_v41, %v4276_v43  ;;  %v2121_v49 = vmul.f32 %v4303_v41, %v4265_v57 }
 0xfb7   : > { %v4307_v38 = vrot.slane %v2094_v27, %v3947_v34  ;;  %v2125_v45 = vadd.f32 %v2124_v37, %v3952_v39  ;;  %v2371_v62 = vpack.c.bf16 %v2119_v46, %v2118_v7 }
 0xfb8   : > { %v2372_v54 = vpack.c.bf16 %v2121_v49, %v2120_v35 }
 0xfb9   : > { %2126 = vxpose.xlu0.b32.start.end [1/1] (short) (narrow) %v2125_v45, 64  ;;  %v2122_v47 = vmul.f32 %v4307_v38, %v2010_v14  ;;  %v2110_v48 = vmul.f32 %v4307_v38, %v4258_v32  ;;  %v2111_v50 = vmul.f32 %v4307_v38, %v4252_v13  ;;  %v2112_v1 = vmul.f32 %v4307_v38, %v4248_v63 }
 0xfba   : > { %v2113_v41 = vmul.f32 %v4307_v38, %v4245_v60 }
 0xfbb   : > { %v2123_v42 = vadd.f32 %v2122_v47, %v3959_v44  ;;  %v2302_v52 = vpack.c.bf16 %v2111_v50, %v2110_v48 }
 0xfbc   : > { %v2303_v23 = vpack.c.bf16 %v2113_v41, %v2112_v1 }
 0xfbd   : > { %3551 = vmatprep.subr.msk.mxu1 %vm542_vm3, %v2123_v42  ;;  %3573 = vmatprep.mubr.msk.bf16.mxu0 %vm665_vm4, %v2302_v52 }
 0xfbe   : > { %3552 = vmatpush3.msk.msra.mxu1 %vm542_vm3, %v2123_v42 }
0x1035   : > { %v2142_v53 = vpop.trf.xlu0 }
0x1036   : > { %3553 = vmatprep.mubr.msk.f32.mxu1 %vm517_vm5, %v2142_v53 }
0x1039   : > { %v2143_v3 = vpop.trf.xlu0 }
0x103a   : > { %3554 = vmatmul.mubr.msk.f32.vlgmr.msra.gmra.mxu1 %vm517_vm5, %v2143_v3 }
0x103d   : > { %v2144_v8 = vpop.trf.xlu0 }
0x103e   : > { %3556 = vmatprep.mubr.msk.f32.mxu1 %vm517_vm5, %v2144_v8 }
0x1041   : > { %v2145_v6 = vpop.trf.xlu0 }
0x1042   : > { %3557 = vmatmul.mubr.msk.f32.gmra.mxu1 %vm517_vm5, %v2145_v6 }
0x1045   : > { %v2146_v9 = vpop.trf.xlu0 }
0x1046   : > { %3559 = vmatprep.mubr.msk.f32.mxu1 %vm517_vm5, %v2146_v9 }
0x1049   : > { %v2147_v40 = vpop.trf.xlu0 }
0x104a   : > { %3560 = vmatmul.mubr.msk.f32.gmra.mxu1 %vm517_vm5, %v2147_v40 }
0x104d   : > { %v2148_v2 = vpop.trf.xlu0 }
0x104e   : > { %3562 = vmatprep.mubr.msk.f32.mxu1 %vm517_vm5, %v2148_v2 }
0x1051   : > { %v2149_v58 = vpop.trf.xlu0 }
0x1052   : > { %3563 = vmatmul.mubr.msk.f32.gmra.mxu1 %vm517_vm5, %v2149_v58 }
0x1053   : > { %3585 = vmatprep.mubr.msk.bf16.mxu1 %vm665_vm4, %v2371_v62 }
0x10fa   : > { %v3555_v11 = vpop.f32.mrf.mxu1 }
0x10fc   : > { %v2251_v12 = vpop.f32.mrf.mxu1 }
0x1102   : > { %v3558_v61 = vpop.f32.mrf.mxu1 }
0x1104   : > { %v2261_v30 = vpop.f32.mrf.mxu1 }
0x110a   : > { %v3561_v36 = vpop.f32.mrf.mxu1 }
0x110c   : > { %v2271_v51 = vpop.f32.mrf.mxu1 }
0x110d   : > { %3774 = vtanh.f32 %v2271_v51 }
0x1112   : > { %v3564_v55 = vpop.f32.mrf.mxu1 }
0x1113   : > { %3776 = vtanh.f32 %v3564_v55 }
0x1114   : > { %v2281_v5 = vpop.f32.mrf.mxu1 }
0x1115   : > { %3778 = vtanh.f32 %v2281_v5 }
0x1116   : > { %3780 = vtanh.f32 %v3561_v36 }
0x1117   : > { %3782 = vtanh.f32 %v2261_v30 }
0x1118   : > { %3784 = vtanh.f32 %v3558_v61 }
0x1119   : > { %3786 = vtanh.f32 %v2251_v12 }
0x111a   : > { %3788 = vtanh.f32 %v3555_v11  ;;  %v3775_v14 = vpop.eup %3774 }
0x1120   : > { %v3777_v15 = vpop.eup %3776 }
0x1122   : > { %v3779_v16 = vpop.eup %3778 }
0x1123   : > { %v2301_v17 = vpack.c.bf16 %v3777_v15, %v3779_v16  ;;  %v3781_v18 = vpop.eup %3780 }
0x1124   : > { %v2300_v20 = vpack.c.bf16 %v3781_v18, %v3775_v14  ;;  %v3783_v21 = vpop.eup %3782 }
0x1125   : > { %3661 = vmatprep.subr.msk.bf16.mxu0 %vm665_vm4, %v2301_v17  ;;  %3577 = vmatprep.subr.bf16.mxu1 %v2301_v17  ;;  %v2320_v19 = vsel %vm665_vm4, %v2301_v17, 0  ;;  %v3785_v26 = vpop.eup %3784 }
0x1126   : > { %3566 = vmatpush3.bf16.xpose.msra.mxu0 %v2320_v19  ;;  %3578 = vmatpush3.bf16.msra.mxu1 %v2301_v17  ;;  %v2299_v28 = vpack.c.bf16 %v3785_v26, %v3783_v21  ;;  %v3787_v29 = vpop.eup %3786  ;;  %v2317_v24 = vsel %vm665_vm4, %v2300_v20, 0 }
0x1127   : > { %3662 = vmatprep.subr.msk.bf16.mxu0 %vm665_vm4, %v2300_v20  ;;  %3579 = vmatprep.subr.bf16.mxu1 %v2300_v20  ;;  %v3789_v31 = vpop.eup %3788 }
0x1128   : > { %v2298_v33 = vpack.c.bf16 %v3789_v31, %v3787_v29  ;;  %v2314_v4 = vsel %vm665_vm4, %v2299_v28, 0 }
0x112a   : > { %3580 = vmatpush3.bf16.msra.mxu1 %v2300_v20  ;;  %v2311_v22 = vsel %vm665_vm4, %v2298_v33, 0 }
0x112b   : > { %3581 = vmatprep.subr.bf16.mxu1 %v2299_v28 }
0x112e   : > { %3568 = vmatpush3.bf16.xpose.msra.mxu0 %v2317_v24  ;;  %3582 = vmatpush3.bf16.msra.mxu1 %v2299_v28 }
0x112f   : > { %3663 = vmatprep.subr.msk.bf16.mxu0 %vm665_vm4, %v2299_v28  ;;  %3583 = vmatprep.subr.bf16.mxu1 %v2298_v33 }
0x1132   : > { %3584 = vmatpush3.bf16.msra.mxu1 %v2298_v33 }
0x1133   : > { %3589 = vmatprep.subr.mxu1 %v3832_v0 }
0x1135   : > { %3586 = vmatmul.mubr.msk.bf16.vlgmr.msra.gmra.mxu1 %vm665_vm4, %v2372_v54 }
0x1136   : > { %3570 = vmatpush3.bf16.xpose.msra.mxu0 %v2314_v4  ;;  %3597 = vmatprep.mubr.msk.f32.mxu1 %vm3833_vm0, %v3832_v0 }
0x1137   : > { %3664 = vmatprep.subr.msk.bf16.mxu0 %vm665_vm4, %v2298_v33 }
0x113e   : > { %3572 = vmatpush3.bf16.xpose.msra.mxu0 %v2311_v22 }
0x1145   : > { %3574 = vmatmul.mubr.msk.bf16.vlgmr.msra.gmra.mxu0 %vm665_vm4, %v2303_v23 }
0x11f5   : > { %v3587_v27 = vpop.f32.mrf.mxu1 }
0x11f6   : > { %v2453_v50 = vmul.f32 %v3587_v27, %v3587_v27 }
0x11f7   : > { %v4353_v37 = vpop.f32.mrf.mxu1 }
0x11f8   : > { %v2451_v47 = vmul.f32 %v4353_v37, %v4353_v37  ;;  %v2458_v38 = vsel %vm665_vm4, %v2453_v50, 0.0 }
0x11f9   : > { %v3588_v45 = vpop.f32.mrf.mxu1 }
0x11fa   : > { %v2455_v52 = vsel %vm665_vm4, %v2451_v47, 0.0  ;;  %v2454_v8 = vmul.f32 %v3588_v45, %v3588_v45 }
0x11fb   : > { %v2416_v48 = vpop.f32.mrf.mxu1 }
0x11fc   : > { %v2452_v42 = vmul.f32 %v2416_v48, %v2416_v48  ;;  %v2460_v9 = vsel %vm665_vm4, %v2454_v8, 0.0 }
0x11fe   : > { %v2456_v53 = vsel %vm665_vm4, %v2452_v42, 0.0 }
0x11ff   : > { %v2457_v3 = vadd.f32 %v2456_v53, %v2455_v52 }
0x1201   : > { %v2459_v6 = vadd.f32 %v2458_v38, %v2457_v3 }
0x1203   : > { %v2461_v40 = vadd.f32 %v2460_v9, %v2459_v6 }
0x1205   : > { %v3575_v2 = vpop.f32.mrf.mxu0  ;;  %v2462_v46 = vrot.slane %v2461_v40, 4 }
0x1206   : > { %v2430_v12 = vmul.f32 %v3575_v2, %v3575_v2 }
0x1207   : > { %v2356_v7 = vpop.f32.mrf.mxu0  ;;  %v2463_v30 = vadd.f32 %v2462_v46, %v2461_v40 }
0x1208   : > { %v2428_v62 = vmul.f32 %v2356_v7, %v2356_v7  ;;  %v2435_v14 = vsel %vm665_vm4, %v2430_v12, 0.0 }
0x1209   : > { %v3576_v58 = vpop.f32.mrf.mxu0  ;;  %v2464_v15 = vrot.slane %v2463_v30, 2 }
0x120a   : > { %v2432_v36 = vsel %vm665_vm4, %v2428_v62, 0.0  ;;  %v2431_v51 = vmul.f32 %v3576_v58, %v3576_v58 }
0x120b   : > { %v2359_v11 = vpop.f32.mrf.mxu0  ;;  %v2465_v19 = vadd.f32 %v2464_v15, %v2463_v30 }
0x120c   : > { %v2429_v61 = vmul.f32 %v2359_v11, %v2359_v11  ;;  %v2437_v17 = vsel %vm665_vm4, %v2431_v51, 0.0 }
0x120d   : > { %v2466_v26 = vrot.slane %v2465_v19, 1 }
0x120e   : > { %v2433_v55 = vsel %vm665_vm4, %v2429_v61, 0.0 }
0x120f   : > { %v2434_v5 = vadd.f32 %v2433_v55, %v2432_v36  ;;  %v2467_v31 = vadd.f32 %v2466_v26, %v2465_v19 }
0x1211   : > { %v2436_v16 = vadd.f32 %v2435_v14, %v2434_v5  ;;  %v2468_v35 = vmax.f32 %v2467_v31, 1e-24 }
0x1213   : > { %v2438_v18 = vadd.f32 %v2437_v17, %v2436_v16 }
0x1215   : > { %v2439_v20 = vrot.slane %v2438_v18, 4 }
0x1217   : > { %v2440_v21 = vadd.f32 %v2439_v20, %v2438_v18 }
0x1219   : > { %v2441_v28 = vrot.slane %v2440_v21, 2 }
0x121b   : > { %v2442_v29 = vadd.f32 %v2441_v28, %v2440_v21 }
0x121d   : > { %v2443_v24 = vrot.slane %v2442_v29, 1 }
0x121f   : > { %v2444_v33 = vadd.f32 %v2443_v24, %v2442_v29 }
0x1221   : > { %v2445_v49 = vmax.f32 %v2444_v33, 1e-24 }
0x1223   : > { %3790 = vrsqrt.f32 %v2445_v49 }
0x1224   : > { %3792 = vrsqrt.f32 %v2468_v35 }
0x1230   : > { %v3791_v54 = vpop.eup %3790 }
0x1231   : > { %v2448_v4 = vmul.f32 %v3791_v54, %v2359_v11  ;;  %v2450_v22 = vmul.f32 %v3791_v54, %v3576_v58  ;;  %v2449_v1 = vmul.f32 %v3791_v54, %v3575_v2  ;;  %v3793_v41 = vpop.eup %3792  ;;  %v2447_v50 = vmul.f32 %v3791_v54, %v2356_v7 }
0x1232   : > { %v2473_v53 = vmul.f32 %v3793_v41, %v3588_v45  ;;  %v2470_v45 = vmul.f32 %v3793_v41, %v4353_v37 }
0x1233   : > { %v4366_v23 = vadd.f32 %v2450_v22, %v4245_v60  ;;  %v4369_v47 = vadd.f32 %v2449_v1, %v4248_v63  ;;  %v4372_v42 = vadd.f32 %v2448_v4, %v4252_v13  ;;  %v4379_v38 = vadd.f32 %v2447_v50, %v4258_v32 }
0x1234   : > { %v2472_v60 = vmul.f32 %v3793_v41, %v3587_v27  ;;  %v2471_v63 = vmul.f32 %v3793_v41, %v2416_v48  ;;  %v4386_v13 = vadd.f32 %v2473_v53, %v4265_v57 }
0x1235   : > { %v2481_v52 = vmax.f32 %v4366_v23, 0.0  ;;  %v2480_v3 = vmax.f32 %v4369_v47, 0.0  ;;  %v2479_v8 = vmax.f32 %v4372_v42, 0.0  ;;  %v2478_v32 = vmax.f32 %v4379_v38, 0.0 }
0x1236   : > { %v2484_v27 = vadd.f32 %v2472_v60, %v4276_v43  ;;  %v2483_v48 = vadd.f32 %v2471_v63, %v4282_v56  ;;  %v2489_v57 = vmax.f32 %v4386_v13, 0.0  ;;  %v2482_v43 = vadd.f32 %v2470_v45, %v4287_v59 }
0x1237   : > { %3590 = vmatpush3.msra.mxu1 %v2481_v52 }
0x1238   : > { %3591 = vmatprep.subr.mxu1 %v3832_v0  ;;  %v2488_v6 = vmax.f32 %v2484_v27, 0.0  ;;  %v2487_v56 = vmax.f32 %v2483_v48, 0.0  ;;  %v2486_v37 = vmax.f32 %v2482_v43, 0.0 }
0x1239   : > { %3592 = vmatpush3.msra.mxu1 %v2480_v3 }
0x123a   : > { %3593 = vmatprep.subr.mxu1 %v3832_v0 }
0x123b   : > { %3594 = vmatpush3.msra.mxu1 %v2479_v8 }
0x123c   : > { %3595 = vmatprep.subr.mxu1 %v3832_v0 }
0x123d   : > { %3596 = vmatpush3.msra.mxu1 %v2478_v32 }
0x123e   : > { %3598 = vmatmul.mubr.msk.f32.vlgmr.msra.gmra.mxu1 %vm295_vm1, %v4270_v25  ;;  %3600 = vmatprep.subr.mxu1 %v3832_v0 }
0x123f   : > { %3601 = vmatpush3.msra.mxu1 %v2489_v57  ;;  %3608 = vmatprep.mubr.msk.f32.mxu1 %vm3833_vm0, %v3832_v0 }
0x1240   : > { %3602 = vmatprep.subr.mxu1 %v3832_v0 }
0x1241   : > { %3603 = vmatpush3.msra.mxu1 %v2488_v6 }
0x1242   : > { %3604 = vmatprep.subr.mxu1 %v3832_v0 }
0x1243   : > { %3605 = vmatpush3.msra.mxu1 %v2487_v56 }
0x1244   : > { %3606 = vmatprep.subr.mxu1 %v3832_v0 }
0x1245   : > { %3607 = vmatpush3.msra.mxu1 %v2486_v37 }
0x1246   : > { %3609 = vmatmul.mubr.msk.f32.vlgmr.msra.gmra.mxu1 %vm295_vm1, %v4294_v10 }
0x12fe   : > { %v2556_v25 = vpop.f32.mrf.mxu1 }
0x12ff   : > { %v2630_v7 = vsel %vm442_vm2, %v2556_v25, -inf }
0x1300   : > { %v3599_v9 = vpop.f32.mrf.mxu1 }
0x1306   : > { %v2626_v59 = vpop.f32.mrf.mxu1 }
0x1307   : > { %v2641_v40 = vsel %vm442_vm2, %v2626_v59, -inf }
0x1308   : > { %2642 = vmax.xlane.f32.xlu1 %v2641_v40  ;;  %v3610_v2 = vpop.f32.mrf.mxu1 }
0x130c   : > { %2631 = vmax.xlane.f32.xlu1 %v2630_v7 }
0x1391   : > { %v2643_v46 = vpop.xlane.xlu1 %2642 }
0x1392   : > { %v2644_v58 = vsub.f32 %v2626_v59, %v2643_v46 }
0x1394   : > { %v2645_v62 = vmul.f32 1.442695, %v2644_v58 }
0x1395   : > { %v2632_v11 = vpop.xlane.xlu1 %2631 }
0x1396   : > { %3794 = vpow2.f32 %v2645_v62  ;;  %v2633_v0 = vsub.f32 %v2556_v25, %v2632_v11 }
0x1398   : > { %v2634_v12 = vmul.f32 1.442695, %v2633_v0 }
0x139a   : > { %3796 = vpow2.f32 %v2634_v12 }
0x13a3   : > { %v3795_v10 = vpop.eup %3794 }
0x13a4   : > { %v2647_v61 = vsel %vm442_vm2, %v3795_v10, 0.0 }
0x13a5   : > { %2648 = vadd.xlane.f32.xlu1 %v2647_v61 }
0x13a7   : > { %v3797_v30 = vpop.eup %3796 }
0x13a8   : > { %v2636_v36 = vsel %vm442_vm2, %v3797_v30, 0.0 }
0x13a9   : > { %2637 = vadd.xlane.f32.xlu0 %v2636_v36 }
0x142e   : > { %v2649_v51 = vpop.xlane.xlu1 %2648 }
0x142f   : > { %3798 = vrcp.f32 %v2649_v51 }
0x1432   : > { %v2638_v55 = vpop.xlane.xlu0 %2637 }
0x1433   : > { %3800 = vrcp.f32 %v2638_v55 }
0x143c   : > { %v3799_v5 = vpop.eup %3798 }
0x143d   : > { %v2651_v14 = vmul.f32 %v3799_v5, %v3795_v10 }
0x143f   : > { %v2663_v15 = vrot.slane %v2651_v14, %v3947_v34 }
0x1440   : > { %v3801_v16 = vpop.eup %3800 }
0x1441   : > { %v2640_v17 = vmul.f32 %v3801_v16, %v3797_v30  ;;  %v2670_v18 = vmul.f32 %v2663_v15, %v2626_v59  ;;  %v2664_v19 = vmul.f32 %v2663_v15, %v2486_v37  ;;  %v2665_v20 = vmul.f32 %v2663_v15, %v2487_v56 }
0x1442   : > { %v4421_v21 = vmul.f32 %v2663_v15, %v2488_v6  ;;  %v4423_v26 = vmul.f32 %v2663_v15, %v2489_v57 }
0x1443   : > { %v2655_v28 = vrot.slane %v2640_v17, %v3947_v34  ;;  %v2671_v29 = vadd.f32 %v2670_v18, %v3952_v39  ;;  %v2917_v31 = vpack.c.bf16 %v2665_v20, %v2664_v19  ;;  %3032 = vst.msk [vmem:[%s4419_s23 + $0x60] sm:$0xff] %vm665_vm4, %v2664_v19  ;;  %3033 = vst.msk [vmem:[%s4419_s23 + $0x68] sm:$0xff] %vm665_vm4, %v2665_v20 }
0x1444   : > { %v2918_v24 = vpack.c.bf16 %v4423_v26, %v4421_v21  ;;  %3034 = vst.msk [vmem:[%s4419_s23 + $0x70] sm:$0xff] %vm665_vm4, %v4421_v21  ;;  %3035 = vst.msk [vmem:[%s4419_s23 + $0x78] sm:$0xff] %vm665_vm4, %v4423_v26 }
0x1445   : > { %2672 = vxpose.xlu1.b32.start.end [1/1] (short) (narrow) %v2671_v29, 64  ;;  %v2668_v34 = vmul.f32 %v2655_v28, %v2556_v25  ;;  %v2656_v39 = vmul.f32 %v2655_v28, %v2478_v32  ;;  %v2657_v33 = vmul.f32 %v2655_v28, %v2479_v8  ;;  %v4445_v35 = vmul.f32 %v2655_v28, %v2480_v3 }
0x1446   : > { %v4449_v49 = vmul.f32 %v2655_v28, %v2481_v52 }
0x1447   : > { %v2669_v54 = vadd.f32 %v2668_v34, %v3959_v44  ;;  %v2848_v4 = vpack.c.bf16 %v2657_v33, %v2656_v39  ;;  %3028 = vst.msk [vmem:[%s4419_s23 + $0x40] sm:$0xff] %vm665_vm4, %v2656_v39  ;;  %3029 = vst.msk [vmem:[%s4419_s23 + $0x48] sm:$0xff] %vm665_vm4, %v2657_v33 }
0x1448   : > { %3030 = vst.msk [vmem:[%s4419_s23 + $0x50] sm:$0xff] %vm665_vm4, %v4445_v35  ;;  %v2849_v22 = vpack.c.bf16 %v4449_v49, %v4445_v35  ;;  %3031 = vst.msk [vmem:[%s4419_s23 + $0x58] sm:$0xff] %vm665_vm4, %v4449_v49 }
0x1449   : > { %3611 = vmatprep.subr.msk.mxu0 %vm542_vm3, %v2669_v54  ;;  %3633 = vmatprep.mubr.msk.bf16.mxu1 %vm665_vm4, %v2848_v4 }
0x144a   : > { %3612 = vmatpush3.msk.msra.mxu0 %vm542_vm3, %v2669_v54 }
0x14c1   : > { %v2688_v44 = vpop.trf.xlu1 }
0x14c2   : > { %3613 = vmatprep.mubr.msk.f32.mxu0 %vm517_vm5, %v2688_v44 }
0x14c5   : > { %v2689_v1 = vpop.trf.xlu1 }
0x14c6   : > { %3614 = vmatmul.mubr.msk.f32.vlgmr.msra.gmra.mxu0 %vm517_vm5, %v2689_v1 }
0x14c9   : > { %v2690_v41 = vpop.trf.xlu1 }
0x14ca   : > { %3616 = vmatprep.mubr.msk.f32.mxu0 %vm517_vm5, %v2690_v41 }
0x14cd   : > { %v2691_v23 = vpop.trf.xlu1 }
0x14ce   : > { %3617 = vmatmul.mubr.msk.f32.gmra.mxu0 %vm517_vm5, %v2691_v23 }
0x14d1   : > { %v2692_v47 = vpop.trf.xlu1 }
0x14d2   : > { %3619 = vmatprep.mubr.msk.f32.mxu0 %vm517_vm5, %v2692_v47 }
0x14d5   : > { %v2693_v50 = vpop.trf.xlu1 }
0x14d6   : > { %3620 = vmatmul.mubr.msk.f32.gmra.mxu0 %vm517_vm5, %v2693_v50 }
0x14d9   : > { %v2694_v42 = vpop.trf.xlu1 }
0x14da   : > { %3622 = vmatprep.mubr.msk.f32.mxu0 %vm517_vm5, %v2694_v42 }
0x14dd   : > { %v2695_v52 = vpop.trf.xlu1 }
0x14de   : > { %3623 = vmatmul.mubr.msk.f32.gmra.mxu0 %vm517_vm5, %v2695_v52 }
0x14df   : > { %3645 = vmatprep.mubr.msk.bf16.mxu0 %vm665_vm4, %v2917_v31 }
0x1586   : > { %v3615_v53 = vpop.f32.mrf.mxu0 }
0x1588   : > { %v2797_v3 = vpop.f32.mrf.mxu0 }
0x158e   : > { %v3618_v38 = vpop.f32.mrf.mxu0 }
0x1590   : > { %v2807_v60 = vpop.f32.mrf.mxu0 }
0x1596   : > { %v3621_v63 = vpop.f32.mrf.mxu0 }
0x1598   : > { %v2817_v8 = vpop.f32.mrf.mxu0 }
0x1599   : > { %3802 = vtanh.f32 %v2817_v8 }
0x159e   : > { %v3624_v13 = vpop.f32.mrf.mxu0 }
0x159f   : > { %3804 = vtanh.f32 %v3624_v13 }
0x15a0   : > { %v2827_v32 = vpop.f32.mrf.mxu0 }
0x15a1   : > { %3806 = vtanh.f32 %v2827_v32 }
0x15a2   : > { %3808 = vtanh.f32 %v3621_v63 }
0x15a3   : > { %3810 = vtanh.f32 %v2807_v60 }
0x15a4   : > { %3812 = vtanh.f32 %v3618_v38 }
0x15a5   : > { %3814 = vtanh.f32 %v2797_v3 }
0x15a6   : > { %3816 = vtanh.f32 %v3615_v53  ;;  %v3803_v27 = vpop.eup %3802 }
0x15ac   : > { %v3805_v45 = vpop.eup %3804 }
0x15ae   : > { %v3807_v48 = vpop.eup %3806 }
0x15af   : > { %v2847_v57 = vpack.c.bf16 %v3805_v45, %v3807_v48  ;;  %v3809_v6 = vpop.eup %3808 }
0x15b0   : > { %v2846_v56 = vpack.c.bf16 %v3809_v6, %v3803_v27  ;;  %v3811_v37 = vpop.eup %3810 }
0x15b1   : > { %3665 = vmatprep.subr.msk.bf16.mxu1 %vm665_vm4, %v2847_v57  ;;  %3637 = vmatprep.subr.bf16.mxu0 %v2847_v57  ;;  %v2866_v43 = vsel %vm665_vm4, %v2847_v57, 0  ;;  %v3813_v25 = vpop.eup %3812 }
0x15b2   : > { %3626 = vmatpush3.bf16.xpose.msra.mxu1 %v2866_v43  ;;  %3638 = vmatpush3.bf16.msra.mxu0 %v2847_v57  ;;  %v2845_v9 = vpack.c.bf16 %v3813_v25, %v3811_v37  ;;  %v3815_v59 = vpop.eup %3814  ;;  %v2863_v2 = vsel %vm665_vm4, %v2846_v56, 0 }
0x15b3   : > { %3666 = vmatprep.subr.msk.bf16.mxu1 %vm665_vm4, %v2846_v56  ;;  %3639 = vmatprep.subr.bf16.mxu0 %v2846_v56  ;;  %v3817_v40 = vpop.eup %3816 }
0x15b4   : > { %v2844_v7 = vpack.c.bf16 %v3817_v40, %v3815_v59  ;;  %v2860_v46 = vsel %vm665_vm4, %v2845_v9, 0 }
0x15b6   : > { %3640 = vmatpush3.bf16.msra.mxu0 %v2846_v56  ;;  %v2857_v58 = vsel %vm665_vm4, %v2844_v7, 0 }
0x15b7   : > { %3641 = vmatprep.subr.bf16.mxu0 %v2845_v9 }
0x15ba   : > { %3628 = vmatpush3.bf16.xpose.msra.mxu1 %v2863_v2  ;;  %3642 = vmatpush3.bf16.msra.mxu0 %v2845_v9 }
0x15bb   : > { %3667 = vmatprep.subr.msk.bf16.mxu1 %vm665_vm4, %v2845_v9  ;;  %3643 = vmatprep.subr.bf16.mxu0 %v2844_v7 }
0x15be   : > { %3644 = vmatpush3.bf16.msra.mxu0 %v2844_v7 }
0x15c1   : > { %3646 = vmatmul.mubr.msk.bf16.vlgmr.msra.gmra.mxu0 %vm665_vm4, %v2918_v24 }
0x15c2   : > { %3630 = vmatpush3.bf16.xpose.msra.mxu1 %v2860_v46 }
0x15c3   : > { %3668 = vmatprep.subr.msk.bf16.mxu1 %vm665_vm4, %v2844_v7 }
0x15ca   : > { %3632 = vmatpush3.bf16.xpose.msra.mxu1 %v2857_v58 }
0x15d1   : > { %3634 = vmatmul.mubr.msk.bf16.vlgmr.msra.gmra.mxu1 %vm665_vm4, %v2849_v22 }
0x1681   : > { %v3647_v62 = vpop.f32.mrf.mxu0 }
0x1682   : > { %v2999_v61 = vmul.f32 %v3647_v62, %v3647_v62 }
0x1683   : > { %v2959_v11 = vpop.f32.mrf.mxu0 }
0x1684   : > { %v2997_v12 = vmul.f32 %v2959_v11, %v2959_v11  ;;  %v3004_v14 = vsel %vm665_vm4, %v2999_v61, 0.0 }
0x1685   : > { %v3648_v0 = vpop.f32.mrf.mxu0 }
0x1686   : > { %v3001_v36 = vsel %vm665_vm4, %v2997_v12, 0.0  ;;  %v3000_v51 = vmul.f32 %v3648_v0, %v3648_v0 }
0x1687   : > { %v2962_v10 = vpop.f32.mrf.mxu0 }
0x1688   : > { %v2998_v30 = vmul.f32 %v2962_v10, %v2962_v10  ;;  %v3006_v16 = vsel %vm665_vm4, %v3000_v51, 0.0 }
0x168a   : > { %v3002_v55 = vsel %vm665_vm4, %v2998_v30, 0.0 }
0x168b   : > { %v3003_v5 = vadd.f32 %v3002_v55, %v3001_v36 }
0x168d   : > { %v3005_v15 = vadd.f32 %v3004_v14, %v3003_v5 }
0x168f   : > { %v3007_v17 = vadd.f32 %v3006_v16, %v3005_v15 }
0x1691   : > { %v3008_v18 = vrot.slane %v3007_v17, 4  ;;  %v3635_v19 = vpop.f32.mrf.mxu1 }
0x1692   : > { %v2976_v34 = vmul.f32 %v3635_v19, %v3635_v19 }
0x1693   : > { %v3009_v20 = vadd.f32 %v3008_v18, %v3007_v17  ;;  %v2902_v21 = vpop.f32.mrf.mxu1 }
0x1694   : > { %v2974_v29 = vmul.f32 %v2902_v21, %v2902_v21  ;;  %v2981_v44 = vsel %vm665_vm4, %v2976_v34, 0.0 }
0x1695   : > { %v3010_v26 = vrot.slane %v3009_v20, 2  ;;  %v3636_v28 = vpop.f32.mrf.mxu1 }
0x1696   : > { %v2978_v35 = vsel %vm665_vm4, %v2974_v29, 0.0  ;;  %v2977_v49 = vmul.f32 %v3636_v28, %v3636_v28 }
0x1697   : > { %v3011_v31 = vadd.f32 %v3010_v26, %v3009_v20  ;;  %v2905_v24 = vpop.f32.mrf.mxu1 }
0x1698   : > { %v2975_v39 = vmul.f32 %v2905_v24, %v2905_v24  ;;  %v2983_v23 = vsel %vm665_vm4, %v2977_v49, 0.0 }
0x1699   : > { %v3012_v33 = vrot.slane %v3011_v31, 1 }
0x169a   : > { %v2979_v54 = vsel %vm665_vm4, %v2975_v39, 0.0 }
0x169b   : > { %v3013_v4 = vadd.f32 %v3012_v33, %v3011_v31  ;;  %v2980_v22 = vadd.f32 %v2979_v54, %v2978_v35 }
0x169d   : > { %v3014_v1 = vmax.f32 %v3013_v4, 1e-24  ;;  %v2982_v41 = vadd.f32 %v2981_v44, %v2980_v22 }
0x169f   : > { %3818 = vrsqrt.f32 %v3014_v1  ;;  %v2984_v47 = vadd.f32 %v2983_v23, %v2982_v41 }
0x16a1   : > { %v2985_v50 = vrot.slane %v2984_v47, 4 }
0x16a3   : > { %v2986_v42 = vadd.f32 %v2985_v50, %v2984_v47 }
0x16a5   : > { %v2987_v52 = vrot.slane %v2986_v42, 2 }
0x16a7   : > { %v2988_v53 = vadd.f32 %v2987_v52, %v2986_v42 }
0x16a9   : > { %v2989_v3 = vrot.slane %v2988_v53, 1 }
0x16ab   : > { %v2990_v38 = vadd.f32 %v2989_v3, %v2988_v53 }
0x16ac   : > { %v3819_v60 = vpop.eup %3818 }
0x16ad   : > { %v3016_v63 = vmul.f32 %v3819_v60, %v2959_v11  ;;  %v3017_v8 = vmul.f32 %v3819_v60, %v2962_v10  ;;  %v3018_v13 = vmul.f32 %v3819_v60, %v3647_v62  ;;  %v3019_v32 = vmul.f32 %v3819_v60, %v3648_v0 }
0x16ae   : > { %v2991_v27 = vmax.f32 %v2990_v38, 1e-24 }
0x16af   : > { %3024 = vst.msk [vmem:[%s4419_s23 + $0x20] sm:$0xff] %vm665_vm4, %v3016_v63  ;;  %3025 = vst.msk [vmem:[%s4419_s23 + $0x28] sm:$0xff] %vm665_vm4, %v3017_v8 }
0x16b0   : > { %3026 = vst.msk [vmem:[%s4419_s23 + $0x30] sm:$0xff] %vm665_vm4, %v3018_v13  ;;  %3027 = vst.msk [vmem:[%s4419_s23 + $0x38] sm:$0xff] %vm665_vm4, %v3019_v32  ;;  %3820 = vrsqrt.f32 %v2991_v27 }
0x16bd   : > { %v3821_v45 = vpop.eup %3820 }
0x16be   : > { %v2993_v48 = vmul.f32 %v3821_v45, %v2902_v21  ;;  %v2994_v57 = vmul.f32 %v3821_v45, %v2905_v24  ;;  %v2995_v6 = vmul.f32 %v3821_v45, %v3635_v19  ;;  %v2996_v43 = vmul.f32 %v3821_v45, %v3636_v28 }
0x16c0   : > { %3020 = vst.msk [vmem:[%s4419_s23] sm:$0xff] %vm665_vm4, %v2993_v48  ;;  %3021 = vst.msk [vmem:[%s4419_s23 + $0x8] sm:$0xff] %vm665_vm4, %v2994_v57 }
0x16c1   : > { %3022 = vst.msk [vmem:[%s4419_s23 + $0x10] sm:$0xff] %vm665_vm4, %v2995_v6  ;;  %3023 = vst.msk [vmem:[%s4419_s23 + $0x18] sm:$0xff] %vm665_vm4, %v2996_v43 }
0x16c2 PF: > { %s16_s21 = sadd.s32 1, %s3830_s21  }
0x16c3   : > { %p13_p4 = scmp.ge.s32.totalorder %s16_s21, 4  }
0x16c5   :  { %15 = sbr.rel (!%p13_p4) target bundleno = 1 (0x1), region = 77 }

</bundles_post_ra>
